<compile_context>
chip_gen: v5e
topology: v5e:2x2
jax: 0.10.0
libtpu: 0.0.40
codegen_flags: <defaults>
</compile_context>

<pallas_src>
import math
from functools import partial

import jax
import jax.numpy as jnp
from jax.experimental import pallas as pl
from jax.experimental.pallas import tpu as pltpu


def _round_up(x, m):
    return (x + m - 1) // m * m


# ---------------------------------------------------------------------------
# Kernel 1: conv1 (as matmul) + bias + ReLU + 2x2/2 max-pool, lane-dense.
# ---------------------------------------------------------------------------
def _conv1_kernel(p_ref, w_ref, b_ref, o_ref):
    """p_ref: (4, 25, M)  stacked pool-phase patch matrices (K in sublanes,
    M = N*14*14 pooled output positions in lanes).
    w_ref: (6, 25), b_ref: (6, 1), o_ref: (6, M) = relu(max_phase(W @ p) + b)."""
    w = w_ref[...]
    acc = jnp.dot(w, p_ref[0], preferred_element_type=jnp.float32)
    for ph in range(1, 4):
        acc = jnp.maximum(acc, jnp.dot(w, p_ref[ph],
                                       preferred_element_type=jnp.float32))
    o_ref[...] = jnp.maximum(acc + b_ref[...], 0.0)


# ---------------------------------------------------------------------------
# Kernel 2: conv2 + bias + ReLU + pool, then fc1+ReLU (feats) and the whole
# DAM head, all in one kernel (activations never leave VMEM/vregs).
# ---------------------------------------------------------------------------
def _conv2_fc_dam_kernel(p2_ref, w2_ref, b2_ref, wfc1_ref, bfc1_ref, *rest,
                         num_hidden, n_spatial, oc2):
    """p2_ref : (4, NB*n_spatial, 150) stacked conv2 pool-phase patches,
               rows ordered (spatial s, batch n) so per-s row pairs are
               contiguous.
    w2_ref : (150, oc2), b2_ref: (1, oc2).
    wfc1_ref: (oc2*n_spatial, P) fc1 weights, rows pre-permuted so the block
              [s*oc2:(s+1)*oc2] multiplies the s-th spatial slice of h2.
    rest   : (wd, bd, prelu_row) * num_hidden, w_final, b_final, o_ref."""
    hid = rest[:3 * num_hidden]
    wf_ref = rest[3 * num_hidden]
    bf_ref = rest[3 * num_hidden + 1]
    o_ref = rest[3 * num_hidden + 2]
    nb = o_ref.shape[0]

    # --- conv2: progressive max over the 4 pool phases, then bias + ReLU ----
    w2 = w2_ref[...]
    acc = jnp.dot(p2_ref[0], w2, preferred_element_type=jnp.float32)
    for ph in range(1, 4):
        acc = jnp.maximum(acc, jnp.dot(p2_ref[ph], w2,
                                       preferred_element_type=jnp.float32))
    h2 = jnp.maximum(acc + b2_ref[...], 0.0)        # (nb*n_spatial, oc2)

    # --- fc1 as a sum of per-spatial-position partial matmuls --------------
    # feats[n, :] = relu( sum_s h2[(s,n), :] @ Wfc1[s-block] + b1 )
    acc1 = jnp.dot(h2[0:nb, :], wfc1_ref[0:oc2, :],
                   preferred_element_type=jnp.float32)
    for s in range(1, n_spatial):
        acc1 = acc1 + jnp.dot(h2[nb * s:nb * (s + 1), :],
                              wfc1_ref[oc2 * s:oc2 * (s + 1), :],
                              preferred_element_type=jnp.float32)
    h = jnp.maximum(acc1 + bfc1_ref[...], 0.0)      # feats, (nb, P)

    # --- DAM head: [Linear + PReLU] * num_hidden, then final Linear --------
    for k in range(num_hidden):
        wk_ref, bk_ref, ak_ref = hid[3 * k], hid[3 * k + 1], hid[3 * k + 2]
        h = jnp.dot(h, wk_ref[...], preferred_element_type=jnp.float32) + bk_ref[...]
        h = jnp.where(h >= 0.0, h, h * ak_ref[...])
    out = jnp.dot(h, wf_ref[...], preferred_element_type=jnp.float32) + bf_ref[...]
    o_ref[...] = out[:, :o_ref.shape[1]]


# ---------------------------------------------------------------------------
# Wrappers (called from inside the jitted forward; glue fuses under jit)
# ---------------------------------------------------------------------------
def conv1_pool(prep, x):
    """x: (N, 1, 32, 32) -> (6, N*14*14) pooled conv1 activations."""
    n = x.shape[0]
    xi = x[:, 0]                                                   # (N, 32, 32)
    # im2col for the 5x5 conv; k ordered (i, j) to match weight.reshape(6, 25)
    cols = jnp.stack([xi[:, i:i + 28, j:j + 28]
                      for i in range(5) for j in range(5)], axis=1)  # (N,25,28,28)
    views = [cols[:, :, di::2, dj::2] for di in (0, 1) for dj in (0, 1)]
    p1 = jnp.stack([v.transpose(1, 0, 2, 3).reshape(25, n * 14 * 14)
                    for v in views], axis=0)                       # (4, 25, N*196)

    m = n * 14 * 14
    return pl.pallas_call(
        _conv1_kernel,
        out_shape=jax.ShapeDtypeStruct((6, m), jnp.float32),
        grid=(1,),
        in_specs=[pl.BlockSpec((4, 25, m), lambda i: (0, 0, 0)),
                  pl.BlockSpec((6, 25), lambda i: (0, 0)),
                  pl.BlockSpec((6, 1), lambda i: (0, 0))],
        out_specs=pl.BlockSpec((6, m), lambda i: (0, 0)),
        compiler_params=pltpu.CompilerParams(dimension_semantics=("arbitrary",)),
    )(p1, prep["conv1_w"], prep["conv1_b"])


def conv2_fc_dam(prep, h1, n, out_dim):
    """h1: (6, N*14*14) from kernel 1 -> (N, out_dim) DAM output."""
    h1r = h1.reshape(6, n, 14, 14)                                 # (C, N, H, W)
    # im2col for conv2; k = c*25 + i*5 + j matches weight.reshape(16, 150)
    cols = jnp.stack([h1r[:, :, i:i + 10, j:j + 10]
                      for i in range(5) for j in range(5)], axis=1)  # (6,25,N,10,10)
    patches = cols.reshape(150, n, 10, 10)
    views = [patches[:, :, di::2, dj::2] for di in (0, 1) for dj in (0, 1)]
    # rows ordered (spatial s, batch n) so the in-kernel fc1 row pairs are contiguous
    p2 = jnp.stack([v.transpose(2, 3, 1, 0).reshape(25 * n, 150)
                    for v in views], axis=0)                       # (4, N*25, 150)

    num_hidden = len(prep["dam_hidden"])
    inputs = [p2, prep["conv2_w"], prep["conv2_b"], prep["fc1_w"], prep["fc1_b"]]
    for (wk, bk, ak) in prep["dam_hidden"]:
        inputs.extend([wk, bk, ak])
    inputs.extend([prep["dam_final_w"], prep["dam_final_b"]])

    def spec(t):
        nd = t.ndim
        return pl.BlockSpec(t.shape, lambda i: (0,) * nd)

    return pl.pallas_call(
        partial(_conv2_fc_dam_kernel, num_hidden=num_hidden, n_spatial=25, oc2=16),
        out_shape=jax.ShapeDtypeStruct((n, out_dim), jnp.float32),
        grid=(1,),
        in_specs=[spec(t) for t in inputs],
        out_specs=pl.BlockSpec((n, out_dim), lambda i: (0, 0)),
        compiler_params=pltpu.CompilerParams(dimension_semantics=("arbitrary",)),
    )(*inputs)


# ---------------------------------------------------------------------------
# Parameter construction (deterministic, PyTorch-default-style uniform init)
# ---------------------------------------------------------------------------
def _init_linear(key, out_dim, in_dim):
    k1, k2 = jax.random.split(key)
    bound = 1.0 / math.sqrt(in_dim)
    w = jax.random.uniform(k1, (out_dim, in_dim), jnp.float32, -bound, bound)
    b = jax.random.uniform(k2, (out_dim,), jnp.float32, -bound, bound)
    return w, b


def _init_conv(key, oc, ic, kh, kw):
    k1, k2 = jax.random.split(key)
    bound = 1.0 / math.sqrt(ic * kh * kw)
    w = jax.random.uniform(k1, (oc, ic, kh, kw), jnp.float32, -bound, bound)
    b = jax.random.uniform(k2, (oc,), jnp.float32, -bound, bound)
    return w, b


def build_dam_dims(input_dim, output_dim, num_layers):
    """Mirrors DAMGeneral.__init__ layer-size logic."""
    ratio = max(input_dim / output_dim, output_dim / input_dim)
    coef = ratio ** (1.0 / num_layers)
    hidden = []
    d = input_dim
    for _ in range(num_layers):
        if d * coef > output_dim:
            hidden.append((d, output_dim))
            d = output_dim
        else:
            nd = math.ceil(d * coef)
            hidden.append((d, nd))
            d = nd
    return hidden, (d, output_dim)


def init_params(key, output_dim=10, num_layers=2):
    keys = jax.random.split(key, 16)
    p = {}
    # LeNet-5 backbone (fc2/fc3 are dead w.r.t. DAMGeneral.forward, which only
    # consumes feats = relu(fc1(.)) of width 120).
    p["conv1_w"], p["conv1_b"] = _init_conv(keys[0], 6, 1, 5, 5)
    p["conv2_w"], p["conv2_b"] = _init_conv(keys[1], 16, 6, 5, 5)
    p["fc1_w"], p["fc1_b"] = _init_linear(keys[2], 120, 16 * 5 * 5)
    # DAM head (input_dim = LeNet fc2 in-features = 120)
    hidden_dims, final_dims = build_dam_dims(120, output_dim, num_layers)
    dam_hidden = []
    for i, (di, do) in enumerate(hidden_dims):
        w, b = _init_linear(keys[5 + i], do, di)
        a = jnp.asarray(0.25, jnp.float32)          # torch.nn.PReLU default init
        dam_hidden.append((w, b, a))
    wf, bf = _init_linear(keys[5 + len(hidden_dims)], final_dims[1], final_dims[0])
    p["dam_hidden"] = dam_hidden
    p["dam_final"] = (wf, bf)
    return p


def _pad_linear(w, b, in_pad, out_pad):
    """torch-style w (out, in) -> (in_pad, out_pad) w^T and (1, out_pad) bias."""
    o, i = w.shape
    wp = jnp.zeros((in_pad, out_pad), jnp.float32).at[:i, :o].set(w.T)
    bp = jnp.zeros((1, out_pad), jnp.float32).at[0, :o].set(b)
    return wp, bp


def prepare_params(raw):
    """One-time weight prep: matmul-form conv weights, fc1 row permutation to
    match the kernel's (spatial, channel) feature order, zero-pad to 128 lanes."""
    prep = {}
    # conv1 in transposed/lane-dense form: (6, 25) LHS, (6, 1) bias column.
    prep["conv1_w"] = raw["conv1_w"].reshape(6, 25).astype(jnp.float32)
    prep["conv1_b"] = raw["conv1_b"].reshape(6, 1).astype(jnp.float32)
    # conv2 as (150, 16) RHS, (1, 16) bias row.
    prep["conv2_w"] = raw["conv2_w"].reshape(16, 150).T.astype(jnp.float32)
    prep["conv2_b"] = raw["conv2_b"].reshape(1, 16).astype(jnp.float32)

    # Uniform padded lane width for the FC/DAM chain.
    dims = [raw["fc1_w"].shape[0]] + [w.shape[0] for (w, _, _) in raw["dam_hidden"]]
    wf, bf = raw["dam_final"]
    dims += [wf.shape[0]]
    P = _round_up(max(dims), 128)

    # fc1: torch feature index = oc*25 + s (NCHW flatten); the kernel consumes
    # rows ordered s*16 + oc, so permute the 400 input rows once here.
    fw = raw["fc1_w"]                                   # (120, 400)
    fw = fw.reshape(fw.shape[0], 16, 25).transpose(2, 1, 0).reshape(400, fw.shape[0])
    prep["fc1_w"] = jnp.zeros((400, P), jnp.float32).at[:, :fw.shape[1]].set(fw)
    prep["fc1_b"] = (jnp.zeros((1, P), jnp.float32)
                     .at[0, :raw["fc1_b"].shape[0]].set(raw["fc1_b"]))

    hidden = []
    for (w, b, a) in raw["dam_hidden"]:
        wp, bp = _pad_linear(w, b, P, P)
        hidden.append((wp, bp, jnp.full((1, P), a, jnp.float32)))
    prep["dam_hidden"] = hidden
    prep["dam_final_w"], prep["dam_final_b"] = _pad_linear(wf, bf, P, P)
    return prep


# ---------------------------------------------------------------------------
# DAMGeneral forward: 2 pallas_calls + one small fused XLA im2col between them
# ---------------------------------------------------------------------------
def dam_general_forward(prep, x, *, out_dim):
    x = x.astype(jnp.float32)
    n = x.shape[0]
    h1 = conv1_pool(prep, x)                  # (6, N*14*14), channels-major
    return conv2_fc_dam(prep, h1, n, out_dim)  # (N, out_dim)


if __name__ == "__main__":
    key = jax.random.PRNGKey(0)
    kx, kp = jax.random.split(key)
    # Classic LeNet-5 expects 1x32x32 inputs so that fc1 sees 16*5*5 = 400 features.
    x = jax.random.normal(kx, (2, 1, 32, 32), jnp.float32)
    raw = init_params(kp, output_dim=10, num_layers=2)
    prep = prepare_params(raw)

    fwd = jax.jit(partial(dam_general_forward, out_dim=10))
    out = jax.block_until_ready(fwd(prep, x))

    assert out.shape == (2, 10) and out.dtype == jnp.float32
    assert bool(jnp.all(jnp.isfinite(out)))
    print("KERNEL_OK")
</pallas_src>

<mosaic_0001>
module attributes {stable_mosaic.version = 11 : i64} {
  func.func @_conv1_kernel(%arg0: i32, %arg1: memref<4x25x392xf32, #tpu.memory_space<vmem>>, %arg2: memref<6x25xf32, #tpu.memory_space<vmem>>, %arg3: memref<6x1xf32, #tpu.memory_space<vmem>>, %arg4: memref<6x392xf32, #tpu.memory_space<vmem>>) attributes {dimension_semantics = [#tpu.dimension_semantics<arbitrary>], iteration_bounds = array<i64: 1>, scalar_prefetch = 0 : i64, scratch_operands = 0 : i64, tpu.core_type = #tpu.core_type<tc>, window_params = [{pipeline_mode = #tpu.pipeline_mode<synchronous>, transform_indices = @transform_0, window_bounds = array<i64: 4, 25, 392>}, {pipeline_mode = #tpu.pipeline_mode<synchronous>, transform_indices = @transform_1, window_bounds = array<i64: 6, 25>}, {pipeline_mode = #tpu.pipeline_mode<synchronous>, transform_indices = @transform_2, window_bounds = array<i64: 6, 1>}, {pipeline_mode = #tpu.pipeline_mode<synchronous>, transform_indices = @transform_3, window_bounds = array<i64: 6, 392>}]} {
    %c0 = arith.constant 0 : index
    %c0_0 = arith.constant 0 : index
    %0 = vector.load %arg2[%c0, %c0_0] : memref<6x25xf32, #tpu.memory_space<vmem>>, vector<6x25xf32>
    %c0_1 = arith.constant 0 : index
    %c0_2 = arith.constant 0 : index
    %c0_3 = arith.constant 0 : index
    %1 = vector.load %arg1[%c0_1, %c0_2, %c0_3] : memref<4x25x392xf32, #tpu.memory_space<vmem>>, vector<1x25x392xf32>
    %2 = vector.shape_cast %1 : vector<1x25x392xf32> to vector<25x392xf32>
    %cst = arith.constant dense<0.000000e+00> : vector<6x392xf32>
    %3 = tpu.matmul %0, %2, %cst {dimension_numbers = #tpu.dot_dimension_numbers<[1], [0], [0], [1], [0, 0, 1, 1], [], []>} : vector<6x25xf32>, vector<25x392xf32>, vector<6x392xf32> -> vector<6x392xf32>
    %c1 = arith.constant 1 : index
    %c0_4 = arith.constant 0 : index
    %c0_5 = arith.constant 0 : index
    %4 = vector.load %arg1[%c1, %c0_4, %c0_5] : memref<4x25x392xf32, #tpu.memory_space<vmem>>, vector<1x25x392xf32>
    %5 = vector.shape_cast %4 : vector<1x25x392xf32> to vector<25x392xf32>
    %cst_6 = arith.constant dense<0.000000e+00> : vector<6x392xf32>
    %6 = tpu.matmul %0, %5, %cst_6 {dimension_numbers = #tpu.dot_dimension_numbers<[1], [0], [0], [1], [0, 0, 1, 1], [], []>} : vector<6x25xf32>, vector<25x392xf32>, vector<6x392xf32> -> vector<6x392xf32>
    %7 = arith.maximumf %3, %6 : vector<6x392xf32>
    %c2 = arith.constant 2 : index
    %c0_7 = arith.constant 0 : index
    %c0_8 = arith.constant 0 : index
    %8 = vector.load %arg1[%c2, %c0_7, %c0_8] : memref<4x25x392xf32, #tpu.memory_space<vmem>>, vector<1x25x392xf32>
    %9 = vector.shape_cast %8 : vector<1x25x392xf32> to vector<25x392xf32>
    %cst_9 = arith.constant dense<0.000000e+00> : vector<6x392xf32>
    %10 = tpu.matmul %0, %9, %cst_9 {dimension_numbers = #tpu.dot_dimension_numbers<[1], [0], [0], [1], [0, 0, 1, 1], [], []>} : vector<6x25xf32>, vector<25x392xf32>, vector<6x392xf32> -> vector<6x392xf32>
    %11 = arith.maximumf %7, %10 : vector<6x392xf32>
    %c3 = arith.constant 3 : index
    %c0_10 = arith.constant 0 : index
    %c0_11 = arith.constant 0 : index
    %12 = vector.load %arg1[%c3, %c0_10, %c0_11] : memref<4x25x392xf32, #tpu.memory_space<vmem>>, vector<1x25x392xf32>
    %13 = vector.shape_cast %12 : vector<1x25x392xf32> to vector<25x392xf32>
    %cst_12 = arith.constant dense<0.000000e+00> : vector<6x392xf32>
    %14 = tpu.matmul %0, %13, %cst_12 {dimension_numbers = #tpu.dot_dimension_numbers<[1], [0], [0], [1], [0, 0, 1, 1], [], []>} : vector<6x25xf32>, vector<25x392xf32>, vector<6x392xf32> -> vector<6x392xf32>
    %15 = arith.maximumf %11, %14 : vector<6x392xf32>
    %c0_13 = arith.constant 0 : index
    %c0_14 = arith.constant 0 : index
    %16 = vector.load %arg3[%c0_13, %c0_14] : memref<6x1xf32, #tpu.memory_space<vmem>>, vector<6x1xf32>
    %17 = vector.broadcast %16 : vector<6x1xf32> to vector<6x392xf32>
    %18 = arith.addf %15, %17 : vector<6x392xf32>
    %cst_15 = arith.constant 0.000000e+00 : f32
    %19 = vector.broadcast %cst_15 : f32 to vector<6x392xf32>
    %20 = arith.maximumf %18, %19 : vector<6x392xf32>
    %c0_16 = arith.constant 0 : index
    %c0_17 = arith.constant 0 : index
    %21 = vector.load %arg4[%c0_16, %c0_17] : memref<6x392xf32, #tpu.memory_space<vmem>>, vector<6x392xf32>
    tpu.vector_store %arg4[%c0_16, %c0_17], %20 {strides = array<i32>} : memref<6x392xf32, #tpu.memory_space<vmem>>, vector<6x392xf32>,
    return
  }
  func.func @transform_0(%arg0: i32) -> (i32, i32, i32) {
    %c0_i32 = arith.constant 0 : i32
    %c0_i32_0 = arith.constant 0 : i32
    %c0_i32_1 = arith.constant 0 : i32
    %c0_i32_2 = arith.constant 0 : i32
    return %c0_i32, %c0_i32_0, %c0_i32_1 : i32, i32, i32
  }
  func.func @transform_1(%arg0: i32) -> (i32, i32) {
    %c0_i32 = arith.constant 0 : i32
    %c0_i32_0 = arith.constant 0 : i32
    %c0_i32_1 = arith.constant 0 : i32
    return %c0_i32, %c0_i32_0 : i32, i32
  }
  func.func @transform_2(%arg0: i32) -> (i32, i32) {
    %c0_i32 = arith.constant 0 : i32
    %c0_i32_0 = arith.constant 0 : i32
    %c0_i32_1 = arith.constant 0 : i32
    return %c0_i32, %c0_i32_0 : i32, i32
  }
  func.func @transform_3(%arg0: i32) -> (i32, i32) {
    %c0_i32 = arith.constant 0 : i32
    %c0_i32_0 = arith.constant 0 : i32
    %c0_i32_1 = arith.constant 0 : i32
    return %c0_i32, %c0_i32_0 : i32, i32
  }
}

module attributes {stable_mosaic.version = 11 : i64} {
  func.func @_conv2_fc_dam_kernel(%arg0: i32, %arg1: memref<4x50x150xf32, #tpu.memory_space<vmem>>, %arg2: memref<150x16xf32, #tpu.memory_space<vmem>>, %arg3: memref<1x16xf32, #tpu.memory_space<vmem>>, %arg4: memref<400x128xf32, #tpu.memory_space<vmem>>, %arg5: memref<1x128xf32, #tpu.memory_space<vmem>>, %arg6: memref<128x128xf32, #tpu.memory_space<vmem>>, %arg7: memref<1x128xf32, #tpu.memory_space<vmem>>, %arg8: memref<1x128xf32, #tpu.memory_space<vmem>>, %arg9: memref<128x128xf32, #tpu.memory_space<vmem>>, %arg10: memref<1x128xf32, #tpu.memory_space<vmem>>, %arg11: memref<1x128xf32, #tpu.memory_space<vmem>>, %arg12: memref<128x128xf32, #tpu.memory_space<vmem>>, %arg13: memref<1x128xf32, #tpu.memory_space<vmem>>, %arg14: memref<2x10xf32, #tpu.memory_space<vmem>>) attributes {dimension_semantics = [#tpu.dimension_semantics<arbitrary>], iteration_bounds = array<i64: 1>, scalar_prefetch = 0 : i64, scratch_operands = 0 : i64, tpu.core_type = #tpu.core_type<tc>, window_params = [{pipeline_mode = #tpu.pipeline_mode<synchronous>, transform_indices = @transform_0, window_bounds = array<i64: 4, 50, 150>}, {pipeline_mode = #tpu.pipeline_mode<synchronous>, transform_indices = @transform_1, window_bounds = array<i64: 150, 16>}, {pipeline_mode = #tpu.pipeline_mode<synchronous>, transform_indices = @transform_2, window_bounds = array<i64: 1, 16>}, {pipeline_mode = #tpu.pipeline_mode<synchronous>, transform_indices = @transform_3, window_bounds = array<i64: 400, 128>}, {pipeline_mode = #tpu.pipeline_mode<synchronous>, transform_indices = @transform_4, window_bounds = array<i64: 1, 128>}, {pipeline_mode = #tpu.pipeline_mode<synchronous>, transform_indices = @transform_5, window_bounds = array<i64: 128, 128>}, {pipeline_mode = #tpu.pipeline_mode<synchronous>, transform_indices = @transform_6, window_bounds = array<i64: 1, 128>}, {pipeline_mode = #tpu.pipeline_mode<synchronous>, transform_indices = @transform_7, window_bounds = array<i64: 1, 128>}, {pipeline_mode = #tpu.pipeline_mode<synchronous>, transform_indices = @transform_8, window_bounds = array<i64: 128, 128>}, {pipeline_mode = #tpu.pipeline_mode<synchronous>, transform_indices = @transform_9, window_bounds = array<i64: 1, 128>}, {pipeline_mode = #tpu.pipeline_mode<synchronous>, transform_indices = @transform_10, window_bounds = array<i64: 1, 128>}, {pipeline_mode = #tpu.pipeline_mode<synchronous>, transform_indices = @transform_11, window_bounds = array<i64: 128, 128>}, {pipeline_mode = #tpu.pipeline_mode<synchronous>, transform_indices = @transform_12, window_bounds = array<i64: 1, 128>}, {pipeline_mode = #tpu.pipeline_mode<synchronous>, transform_indices = @transform_13, window_bounds = array<i64: 2, 10>}]} {
    %c0 = arith.constant 0 : index
    %c0_0 = arith.constant 0 : index
    %0 = vector.load %arg2[%c0, %c0_0] : memref<150x16xf32, #tpu.memory_space<vmem>>, vector<150x16xf32>
    %c0_1 = arith.constant 0 : index
    %c0_2 = arith.constant 0 : index
    %c0_3 = arith.constant 0 : index
    %1 = vector.load %arg1[%c0_1, %c0_2, %c0_3] : memref<4x50x150xf32, #tpu.memory_space<vmem>>, vector<1x50x150xf32>
    %2 = vector.shape_cast %1 : vector<1x50x150xf32> to vector<50x150xf32>
    %cst = arith.constant dense<0.000000e+00> : vector<50x16xf32>
    %3 = tpu.matmul %2, %0, %cst {dimension_numbers = #tpu.dot_dimension_numbers<[1], [0], [0], [1], [0, 0, 1, 1], [], []>} : vector<50x150xf32>, vector<150x16xf32>, vector<50x16xf32> -> vector<50x16xf32>
    %c1 = arith.constant 1 : index
    %c0_4 = arith.constant 0 : index
    %c0_5 = arith.constant 0 : index
    %4 = vector.load %arg1[%c1, %c0_4, %c0_5] : memref<4x50x150xf32, #tpu.memory_space<vmem>>, vector<1x50x150xf32>
    %5 = vector.shape_cast %4 : vector<1x50x150xf32> to vector<50x150xf32>
    %cst_6 = arith.constant dense<0.000000e+00> : vector<50x16xf32>
    %6 = tpu.matmul %5, %0, %cst_6 {dimension_numbers = #tpu.dot_dimension_numbers<[1], [0], [0], [1], [0, 0, 1, 1], [], []>} : vector<50x150xf32>, vector<150x16xf32>, vector<50x16xf32> -> vector<50x16xf32>
    %7 = arith.maximumf %3, %6 : vector<50x16xf32>
    %c2 = arith.constant 2 : index
    %c0_7 = arith.constant 0 : index
    %c0_8 = arith.constant 0 : index
    %8 = vector.load %arg1[%c2, %c0_7, %c0_8] : memref<4x50x150xf32, #tpu.memory_space<vmem>>, vector<1x50x150xf32>
    %9 = vector.shape_cast %8 : vector<1x50x150xf32> to vector<50x150xf32>
    %cst_9 = arith.constant dense<0.000000e+00> : vector<50x16xf32>
    %10 = tpu.matmul %9, %0, %cst_9 {dimension_numbers = #tpu.dot_dimension_numbers<[1], [0], [0], [1], [0, 0, 1, 1], [], []>} : vector<50x150xf32>, vector<150x16xf32>, vector<50x16xf32> -> vector<50x16xf32>
    %11 = arith.maximumf %7, %10 : vector<50x16xf32>
    %c3 = arith.constant 3 : index
    %c0_10 = arith.constant 0 : index
    %c0_11 = arith.constant 0 : index
    %12 = vector.load %arg1[%c3, %c0_10, %c0_11] : memref<4x50x150xf32, #tpu.memory_space<vmem>>, vector<1x50x150xf32>
    %13 = vector.shape_cast %12 : vector<1x50x150xf32> to vector<50x150xf32>
    %cst_12 = arith.constant dense<0.000000e+00> : vector<50x16xf32>
    %14 = tpu.matmul %13, %0, %cst_12 {dimension_numbers = #tpu.dot_dimension_numbers<[1], [0], [0], [1], [0, 0, 1, 1], [], []>} : vector<50x150xf32>, vector<150x16xf32>, vector<50x16xf32> -> vector<50x16xf32>
    %15 = arith.maximumf %11, %14 : vector<50x16xf32>
    %c0_13 = arith.constant 0 : index
    %c0_14 = arith.constant 0 : index
    %16 = vector.load %arg3[%c0_13, %c0_14] : memref<1x16xf32, #tpu.memory_space<vmem>>, vector<1x16xf32>
    %17 = vector.broadcast %16 : vector<1x16xf32> to vector<50x16xf32>
    %18 = arith.addf %15, %17 : vector<50x16xf32>
    %cst_15 = arith.constant 0.000000e+00 : f32
    %19 = vector.broadcast %cst_15 : f32 to vector<50x16xf32>
    %20 = arith.maximumf %18, %19 : vector<50x16xf32>
    %21 = vector.extract_strided_slice %20 {offsets = [0, 0], sizes = [2, 16], strides = [1, 1]} : vector<50x16xf32> to vector<2x16xf32>
    %c0_16 = arith.constant 0 : index
    %c0_17 = arith.constant 0 : index
    %22 = vector.load %arg4[%c0_16, %c0_17] : memref<400x128xf32, #tpu.memory_space<vmem>>, vector<16x128xf32>
    %cst_18 = arith.constant dense<0.000000e+00> : vector<2x128xf32>
    %23 = tpu.matmul %21, %22, %cst_18 {dimension_numbers = #tpu.dot_dimension_numbers<[1], [0], [0], [1], [0, 0, 1, 1], [], []>} : vector<2x16xf32>, vector<16x128xf32>, vector<2x128xf32> -> vector<2x128xf32>
    %24 = vector.extract_strided_slice %20 {offsets = [2, 0], sizes = [2, 16], strides = [1, 1]} : vector<50x16xf32> to vector<2x16xf32>
    %c16 = arith.constant 16 : index
    %c0_19 = arith.constant 0 : index
    %25 = vector.load %arg4[%c16, %c0_19] : memref<400x128xf32, #tpu.memory_space<vmem>>, vector<16x128xf32>
    %cst_20 = arith.constant dense<0.000000e+00> : vector<2x128xf32>
    %26 = tpu.matmul %24, %25, %cst_20 {dimension_numbers = #tpu.dot_dimension_numbers<[1], [0], [0], [1], [0, 0, 1, 1], [], []>} : vector<2x16xf32>, vector<16x128xf32>, vector<2x128xf32> -> vector<2x128xf32>
    %27 = arith.addf %23, %26 : vector<2x128xf32>
    %28 = vector.extract_strided_slice %20 {offsets = [4, 0], sizes = [2, 16], strides = [1, 1]} : vector<50x16xf32> to vector<2x16xf32>
    %c32 = arith.constant 32 : index
    %c0_21 = arith.constant 0 : index
    %29 = vector.load %arg4[%c32, %c0_21] : memref<400x128xf32, #tpu.memory_space<vmem>>, vector<16x128xf32>
    %cst_22 = arith.constant dense<0.000000e+00> : vector<2x128xf32>
    %30 = tpu.matmul %28, %29, %cst_22 {dimension_numbers = #tpu.dot_dimension_numbers<[1], [0], [0], [1], [0, 0, 1, 1], [], []>} : vector<2x16xf32>, vector<16x128xf32>, vector<2x128xf32> -> vector<2x128xf32>
    %31 = arith.addf %27, %30 : vector<2x128xf32>
    %32 = vector.extract_strided_slice %20 {offsets = [6, 0], sizes = [2, 16], strides = [1, 1]} : vector<50x16xf32> to vector<2x16xf32>
    %c48 = arith.constant 48 : index
    %c0_23 = arith.constant 0 : index
    %33 = vector.load %arg4[%c48, %c0_23] : memref<400x128xf32, #tpu.memory_space<vmem>>, vector<16x128xf32>
    %cst_24 = arith.constant dense<0.000000e+00> : vector<2x128xf32>
    %34 = tpu.matmul %32, %33, %cst_24 {dimension_numbers = #tpu.dot_dimension_numbers<[1], [0], [0], [1], [0, 0, 1, 1], [], []>} : vector<2x16xf32>, vector<16x128xf32>, vector<2x128xf32> -> vector<2x128xf32>
    %35 = arith.addf %31, %34 : vector<2x128xf32>
    %36 = vector.extract_strided_slice %20 {offsets = [8, 0], sizes = [2, 16], strides = [1, 1]} : vector<50x16xf32> to vector<2x16xf32>
    %c64 = arith.constant 64 : index
    %c0_25 = arith.constant 0 : index
    %37 = vector.load %arg4[%c64, %c0_25] : memref<400x128xf32, #tpu.memory_space<vmem>>, vector<16x128xf32>
    %cst_26 = arith.constant dense<0.000000e+00> : vector<2x128xf32>
    %38 = tpu.matmul %36, %37, %cst_26 {dimension_numbers = #tpu.dot_dimension_numbers<[1], [0], [0], [1], [0, 0, 1, 1], [], []>} : vector<2x16xf32>, vector<16x128xf32>, vector<2x128xf32> -> vector<2x128xf32>
    %39 = arith.addf %35, %38 : vector<2x128xf32>
    %40 = vector.extract_strided_slice %20 {offsets = [10, 0], sizes = [2, 16], strides = [1, 1]} : vector<50x16xf32> to vector<2x16xf32>
    %c80 = arith.constant 80 : index
    %c0_27 = arith.constant 0 : index
    %41 = vector.load %arg4[%c80, %c0_27] : memref<400x128xf32, #tpu.memory_space<vmem>>, vector<16x128xf32>
    %cst_28 = arith.constant dense<0.000000e+00> : vector<2x128xf32>
    %42 = tpu.matmul %40, %41, %cst_28 {dimension_numbers = #tpu.dot_dimension_numbers<[1], [0], [0], [1], [0, 0, 1, 1], [], []>} : vector<2x16xf32>, vector<16x128xf32>, vector<2x128xf32> -> vector<2x128xf32>
    %43 = arith.addf %39, %42 : vector<2x128xf32>
    %44 = vector.extract_strided_slice %20 {offsets = [12, 0], sizes = [2, 16], strides = [1, 1]} : vector<50x16xf32> to vector<2x16xf32>
    %c96 = arith.constant 96 : index
    %c0_29 = arith.constant 0 : index
    %45 = vector.load %arg4[%c96, %c0_29] : memref<400x128xf32, #tpu.memory_space<vmem>>, vector<16x128xf32>
    %cst_30 = arith.constant dense<0.000000e+00> : vector<2x128xf32>
    %46 = tpu.matmul %44, %45, %cst_30 {dimension_numbers = #tpu.dot_dimension_numbers<[1], [0], [0], [1], [0, 0, 1, 1], [], []>} : vector<2x16xf32>, vector<16x128xf32>, vector<2x128xf32> -> vector<2x128xf32>
    %47 = arith.addf %43, %46 : vector<2x128xf32>
    %48 = vector.extract_strided_slice %20 {offsets = [14, 0], sizes = [2, 16], strides = [1, 1]} : vector<50x16xf32> to vector<2x16xf32>
    %c112 = arith.constant 112 : index
    %c0_31 = arith.constant 0 : index
    %49 = vector.load %arg4[%c112, %c0_31] : memref<400x128xf32, #tpu.memory_space<vmem>>, vector<16x128xf32>
    %cst_32 = arith.constant dense<0.000000e+00> : vector<2x128xf32>
    %50 = tpu.matmul %48, %49, %cst_32 {dimension_numbers = #tpu.dot_dimension_numbers<[1], [0], [0], [1], [0, 0, 1, 1], [], []>} : vector<2x16xf32>, vector<16x128xf32>, vector<2x128xf32> -> vector<2x128xf32>
    %51 = arith.addf %47, %50 : vector<2x128xf32>
    %52 = vector.extract_strided_slice %20 {offsets = [16, 0], sizes = [2, 16], strides = [1, 1]} : vector<50x16xf32> to vector<2x16xf32>
    %c128 = arith.constant 128 : index
    %c0_33 = arith.constant 0 : index
    %53 = vector.load %arg4[%c128, %c0_33] : memref<400x128xf32, #tpu.memory_space<vmem>>, vector<16x128xf32>
    %cst_34 = arith.constant dense<0.000000e+00> : vector<2x128xf32>
    %54 = tpu.matmul %52, %53, %cst_34 {dimension_numbers = #tpu.dot_dimension_numbers<[1], [0], [0], [1], [0, 0, 1, 1], [], []>} : vector<2x16xf32>, vector<16x128xf32>, vector<2x128xf32> -> vector<2x128xf32>
    %55 = arith.addf %51, %54 : vector<2x128xf32>
    %56 = vector.extract_strided_slice %20 {offsets = [18, 0], sizes = [2, 16], strides = [1, 1]} : vector<50x16xf32> to vector<2x16xf32>
    %c144 = arith.constant 144 : index
    %c0_35 = arith.constant 0 : index
    %57 = vector.load %arg4[%c144, %c0_35] : memref<400x128xf32, #tpu.memory_space<vmem>>, vector<16x128xf32>
    %cst_36 = arith.constant dense<0.000000e+00> : vector<2x128xf32>
    %58 = tpu.matmul %56, %57, %cst_36 {dimension_numbers = #tpu.dot_dimension_numbers<[1], [0], [0], [1], [0, 0, 1, 1], [], []>} : vector<2x16xf32>, vector<16x128xf32>, vector<2x128xf32> -> vector<2x128xf32>
    %59 = arith.addf %55, %58 : vector<2x128xf32>
    %60 = vector.extract_strided_slice %20 {offsets = [20, 0], sizes = [2, 16], strides = [1, 1]} : vector<50x16xf32> to vector<2x16xf32>
    %c160 = arith.constant 160 : index
    %c0_37 = arith.constant 0 : index
    %61 = vector.load %arg4[%c160, %c0_37] : memref<400x128xf32, #tpu.memory_space<vmem>>, vector<16x128xf32>
    %cst_38 = arith.constant dense<0.000000e+00> : vector<2x128xf32>
    %62 = tpu.matmul %60, %61, %cst_38 {dimension_numbers = #tpu.dot_dimension_numbers<[1], [0], [0], [1], [0, 0, 1, 1], [], []>} : vector<2x16xf32>, vector<16x128xf32>, vector<2x128xf32> -> vector<2x128xf32>
    %63 = arith.addf %59, %62 : vector<2x128xf32>
    %64 = vector.extract_strided_slice %20 {offsets = [22, 0], sizes = [2, 16], strides = [1, 1]} : vector<50x16xf32> to vector<2x16xf32>
    %c176 = arith.constant 176 : index
    %c0_39 = arith.constant 0 : index
    %65 = vector.load %arg4[%c176, %c0_39] : memref<400x128xf32, #tpu.memory_space<vmem>>, vector<16x128xf32>
    %cst_40 = arith.constant dense<0.000000e+00> : vector<2x128xf32>
    %66 = tpu.matmul %64, %65, %cst_40 {dimension_numbers = #tpu.dot_dimension_numbers<[1], [0], [0], [1], [0, 0, 1, 1], [], []>} : vector<2x16xf32>, vector<16x128xf32>, vector<2x128xf32> -> vector<2x128xf32>
    %67 = arith.addf %63, %66 : vector<2x128xf32>
    %68 = vector.extract_strided_slice %20 {offsets = [24, 0], sizes = [2, 16], strides = [1, 1]} : vector<50x16xf32> to vector<2x16xf32>
    %c192 = arith.constant 192 : index
    %c0_41 = arith.constant 0 : index
    %69 = vector.load %arg4[%c192, %c0_41] : memref<400x128xf32, #tpu.memory_space<vmem>>, vector<16x128xf32>
    %cst_42 = arith.constant dense<0.000000e+00> : vector<2x128xf32>
    %70 = tpu.matmul %68, %69, %cst_42 {dimension_numbers = #tpu.dot_dimension_numbers<[1], [0], [0], [1], [0, 0, 1, 1], [], []>} : vector<2x16xf32>, vector<16x128xf32>, vector<2x128xf32> -> vector<2x128xf32>
    %71 = arith.addf %67, %70 : vector<2x128xf32>
    %72 = vector.extract_strided_slice %20 {offsets = [26, 0], sizes = [2, 16], strides = [1, 1]} : vector<50x16xf32> to vector<2x16xf32>
    %c208 = arith.constant 208 : index
    %c0_43 = arith.constant 0 : index
    %73 = vector.load %arg4[%c208, %c0_43] : memref<400x128xf32, #tpu.memory_space<vmem>>, vector<16x128xf32>
    %cst_44 = arith.constant dense<0.000000e+00> : vector<2x128xf32>
    %74 = tpu.matmul %72, %73, %cst_44 {dimension_numbers = #tpu.dot_dimension_numbers<[1], [0], [0], [1], [0, 0, 1, 1], [], []>} : vector<2x16xf32>, vector<16x128xf32>, vector<2x128xf32> -> vector<2x128xf32>
    %75 = arith.addf %71, %74 : vector<2x128xf32>
    %76 = vector.extract_strided_slice %20 {offsets = [28, 0], sizes = [2, 16], strides = [1, 1]} : vector<50x16xf32> to vector<2x16xf32>
    %c224 = arith.constant 224 : index
    %c0_45 = arith.constant 0 : index
    %77 = vector.load %arg4[%c224, %c0_45] : memref<400x128xf32, #tpu.memory_space<vmem>>, vector<16x128xf32>
    %cst_46 = arith.constant dense<0.000000e+00> : vector<2x128xf32>
    %78 = tpu.matmul %76, %77, %cst_46 {dimension_numbers = #tpu.dot_dimension_numbers<[1], [0], [0], [1], [0, 0, 1, 1], [], []>} : vector<2x16xf32>, vector<16x128xf32>, vector<2x128xf32> -> vector<2x128xf32>
    %79 = arith.addf %75, %78 : vector<2x128xf32>
    %80 = vector.extract_strided_slice %20 {offsets = [30, 0], sizes = [2, 16], strides = [1, 1]} : vector<50x16xf32> to vector<2x16xf32>
    %c240 = arith.constant 240 : index
    %c0_47 = arith.constant 0 : index
    %81 = vector.load %arg4[%c240, %c0_47] : memref<400x128xf32, #tpu.memory_space<vmem>>, vector<16x128xf32>
    %cst_48 = arith.constant dense<0.000000e+00> : vector<2x128xf32>
    %82 = tpu.matmul %80, %81, %cst_48 {dimension_numbers = #tpu.dot_dimension_numbers<[1], [0], [0], [1], [0, 0, 1, 1], [], []>} : vector<2x16xf32>, vector<16x128xf32>, vector<2x128xf32> -> vector<2x128xf32>
    %83 = arith.addf %79, %82 : vector<2x128xf32>
    %84 = vector.extract_strided_slice %20 {offsets = [32, 0], sizes = [2, 16], strides = [1, 1]} : vector<50x16xf32> to vector<2x16xf32>
    %c256 = arith.constant 256 : index
    %c0_49 = arith.constant 0 : index
    %85 = vector.load %arg4[%c256, %c0_49] : memref<400x128xf32, #tpu.memory_space<vmem>>, vector<16x128xf32>
    %cst_50 = arith.constant dense<0.000000e+00> : vector<2x128xf32>
    %86 = tpu.matmul %84, %85, %cst_50 {dimension_numbers = #tpu.dot_dimension_numbers<[1], [0], [0], [1], [0, 0, 1, 1], [], []>} : vector<2x16xf32>, vector<16x128xf32>, vector<2x128xf32> -> vector<2x128xf32>
    %87 = arith.addf %83, %86 : vector<2x128xf32>
    %88 = vector.extract_strided_slice %20 {offsets = [34, 0], sizes = [2, 16], strides = [1, 1]} : vector<50x16xf32> to vector<2x16xf32>
    %c272 = arith.constant 272 : index
    %c0_51 = arith.constant 0 : index
    %89 = vector.load %arg4[%c272, %c0_51] : memref<400x128xf32, #tpu.memory_space<vmem>>, vector<16x128xf32>
    %cst_52 = arith.constant dense<0.000000e+00> : vector<2x128xf32>
    %90 = tpu.matmul %88, %89, %cst_52 {dimension_numbers = #tpu.dot_dimension_numbers<[1], [0], [0], [1], [0, 0, 1, 1], [], []>} : vector<2x16xf32>, vector<16x128xf32>, vector<2x128xf32> -> vector<2x128xf32>
    %91 = arith.addf %87, %90 : vector<2x128xf32>
    %92 = vector.extract_strided_slice %20 {offsets = [36, 0], sizes = [2, 16], strides = [1, 1]} : vector<50x16xf32> to vector<2x16xf32>
    %c288 = arith.constant 288 : index
    %c0_53 = arith.constant 0 : index
    %93 = vector.load %arg4[%c288, %c0_53] : memref<400x128xf32, #tpu.memory_space<vmem>>, vector<16x128xf32>
    %cst_54 = arith.constant dense<0.000000e+00> : vector<2x128xf32>
    %94 = tpu.matmul %92, %93, %cst_54 {dimension_numbers = #tpu.dot_dimension_numbers<[1], [0], [0], [1], [0, 0, 1, 1], [], []>} : vector<2x16xf32>, vector<16x128xf32>, vector<2x128xf32> -> vector<2x128xf32>
    %95 = arith.addf %91, %94 : vector<2x128xf32>
    %96 = vector.extract_strided_slice %20 {offsets = [38, 0], sizes = [2, 16], strides = [1, 1]} : vector<50x16xf32> to vector<2x16xf32>
    %c304 = arith.constant 304 : index
    %c0_55 = arith.constant 0 : index
    %97 = vector.load %arg4[%c304, %c0_55] : memref<400x128xf32, #tpu.memory_space<vmem>>, vector<16x128xf32>
    %cst_56 = arith.constant dense<0.000000e+00> : vector<2x128xf32>
    %98 = tpu.matmul %96, %97, %cst_56 {dimension_numbers = #tpu.dot_dimension_numbers<[1], [0], [0], [1], [0, 0, 1, 1], [], []>} : vector<2x16xf32>, vector<16x128xf32>, vector<2x128xf32> -> vector<2x128xf32>
    %99 = arith.addf %95, %98 : vector<2x128xf32>
    %100 = vector.extract_strided_slice %20 {offsets = [40, 0], sizes = [2, 16], strides = [1, 1]} : vector<50x16xf32> to vector<2x16xf32>
    %c320 = arith.constant 320 : index
    %c0_57 = arith.constant 0 : index
    %101 = vector.load %arg4[%c320, %c0_57] : memref<400x128xf32, #tpu.memory_space<vmem>>, vector<16x128xf32>
    %cst_58 = arith.constant dense<0.000000e+00> : vector<2x128xf32>
    %102 = tpu.matmul %100, %101, %cst_58 {dimension_numbers = #tpu.dot_dimension_numbers<[1], [0], [0], [1], [0, 0, 1, 1], [], []>} : vector<2x16xf32>, vector<16x128xf32>, vector<2x128xf32> -> vector<2x128xf32>
    %103 = arith.addf %99, %102 : vector<2x128xf32>
    %104 = vector.extract_strided_slice %20 {offsets = [42, 0], sizes = [2, 16], strides = [1, 1]} : vector<50x16xf32> to vector<2x16xf32>
    %c336 = arith.constant 336 : index
    %c0_59 = arith.constant 0 : index
    %105 = vector.load %arg4[%c336, %c0_59] : memref<400x128xf32, #tpu.memory_space<vmem>>, vector<16x128xf32>
    %cst_60 = arith.constant dense<0.000000e+00> : vector<2x128xf32>
    %106 = tpu.matmul %104, %105, %cst_60 {dimension_numbers = #tpu.dot_dimension_numbers<[1], [0], [0], [1], [0, 0, 1, 1], [], []>} : vector<2x16xf32>, vector<16x128xf32>, vector<2x128xf32> -> vector<2x128xf32>
    %107 = arith.addf %103, %106 : vector<2x128xf32>
    %108 = vector.extract_strided_slice %20 {offsets = [44, 0], sizes = [2, 16], strides = [1, 1]} : vector<50x16xf32> to vector<2x16xf32>
    %c352 = arith.constant 352 : index
    %c0_61 = arith.constant 0 : index
    %109 = vector.load %arg4[%c352, %c0_61] : memref<400x128xf32, #tpu.memory_space<vmem>>, vector<16x128xf32>
    %cst_62 = arith.constant dense<0.000000e+00> : vector<2x128xf32>
    %110 = tpu.matmul %108, %109, %cst_62 {dimension_numbers = #tpu.dot_dimension_numbers<[1], [0], [0], [1], [0, 0, 1, 1], [], []>} : vector<2x16xf32>, vector<16x128xf32>, vector<2x128xf32> -> vector<2x128xf32>
    %111 = arith.addf %107, %110 : vector<2x128xf32>
    %112 = vector.extract_strided_slice %20 {offsets = [46, 0], sizes = [2, 16], strides = [1, 1]} : vector<50x16xf32> to vector<2x16xf32>
    %c368 = arith.constant 368 : index
    %c0_63 = arith.constant 0 : index
    %113 = vector.load %arg4[%c368, %c0_63] : memref<400x128xf32, #tpu.memory_space<vmem>>, vector<16x128xf32>
    %cst_64 = arith.constant dense<0.000000e+00> : vector<2x128xf32>
    %114 = tpu.matmul %112, %113, %cst_64 {dimension_numbers = #tpu.dot_dimension_numbers<[1], [0], [0], [1], [0, 0, 1, 1], [], []>} : vector<2x16xf32>, vector<16x128xf32>, vector<2x128xf32> -> vector<2x128xf32>
    %115 = arith.addf %111, %114 : vector<2x128xf32>
    %116 = vector.extract_strided_slice %20 {offsets = [48, 0], sizes = [2, 16], strides = [1, 1]} : vector<50x16xf32> to vector<2x16xf32>
    %c384 = arith.constant 384 : index
    %c0_65 = arith.constant 0 : index
    %117 = vector.load %arg4[%c384, %c0_65] : memref<400x128xf32, #tpu.memory_space<vmem>>, vector<16x128xf32>
    %cst_66 = arith.constant dense<0.000000e+00> : vector<2x128xf32>
    %118 = tpu.matmul %116, %117, %cst_66 {dimension_numbers = #tpu.dot_dimension_numbers<[1], [0], [0], [1], [0, 0, 1, 1], [], []>} : vector<2x16xf32>, vector<16x128xf32>, vector<2x128xf32> -> vector<2x128xf32>
    %119 = arith.addf %115, %118 : vector<2x128xf32>
    %c0_67 = arith.constant 0 : index
    %c0_68 = arith.constant 0 : index
    %120 = vector.load %arg5[%c0_67, %c0_68] : memref<1x128xf32, #tpu.memory_space<vmem>>, vector<1x128xf32>
    %121 = vector.broadcast %120 : vector<1x128xf32> to vector<2x128xf32>
    %122 = arith.addf %119, %121 : vector<2x128xf32>
    %cst_69 = arith.constant 0.000000e+00 : f32
    %123 = vector.broadcast %cst_69 : f32 to vector<2x128xf32>
    %124 = arith.maximumf %122, %123 : vector<2x128xf32>
    %c0_70 = arith.constant 0 : index
    %c0_71 = arith.constant 0 : index
    %125 = vector.load %arg6[%c0_70, %c0_71] : memref<128x128xf32, #tpu.memory_space<vmem>>, vector<128x128xf32>
    %cst_72 = arith.constant dense<0.000000e+00> : vector<2x128xf32>
    %126 = tpu.matmul %124, %125, %cst_72 {dimension_numbers = #tpu.dot_dimension_numbers<[1], [0], [0], [1], [0, 0, 1, 1], [], []>} : vector<2x128xf32>, vector<128x128xf32>, vector<2x128xf32> -> vector<2x128xf32>
    %c0_73 = arith.constant 0 : index
    %c0_74 = arith.constant 0 : index
    %127 = vector.load %arg7[%c0_73, %c0_74] : memref<1x128xf32, #tpu.memory_space<vmem>>, vector<1x128xf32>
    %128 = vector.broadcast %127 : vector<1x128xf32> to vector<2x128xf32>
    %129 = arith.addf %126, %128 : vector<2x128xf32>
    %cst_75 = arith.constant 0.000000e+00 : f32
    %130 = vector.broadcast %cst_75 : f32 to vector<2x128xf32>
    %131 = arith.cmpf oge, %129, %130 : vector<2x128xf32>
    %c0_76 = arith.constant 0 : index
    %c0_77 = arith.constant 0 : index
    %132 = vector.load %arg8[%c0_76, %c0_77] : memref<1x128xf32, #tpu.memory_space<vmem>>, vector<1x128xf32>
    %133 = vector.broadcast %132 : vector<1x128xf32> to vector<2x128xf32>
    %134 = arith.mulf %129, %133 : vector<2x128xf32>
    %135 = arith.select %131, %129, %134 : vector<2x128xi1>, vector<2x128xf32>
    %c0_78 = arith.constant 0 : index
    %c0_79 = arith.constant 0 : index
    %136 = vector.load %arg9[%c0_78, %c0_79] : memref<128x128xf32, #tpu.memory_space<vmem>>, vector<128x128xf32>
    %cst_80 = arith.constant dense<0.000000e+00> : vector<2x128xf32>
    %137 = tpu.matmul %135, %136, %cst_80 {dimension_numbers = #tpu.dot_dimension_numbers<[1], [0], [0], [1], [0, 0, 1, 1], [], []>} : vector<2x128xf32>, vector<128x128xf32>, vector<2x128xf32> -> vector<2x128xf32>
    %c0_81 = arith.constant 0 : index
    %c0_82 = arith.constant 0 : index
    %138 = vector.load %arg10[%c0_81, %c0_82] : memref<1x128xf32, #tpu.memory_space<vmem>>, vector<1x128xf32>
    %139 = vector.broadcast %138 : vector<1x128xf32> to vector<2x128xf32>
    %140 = arith.addf %137, %139 : vector<2x128xf32>
    %cst_83 = arith.constant 0.000000e+00 : f32
    %141 = vector.broadcast %cst_83 : f32 to vector<2x128xf32>
    %142 = arith.cmpf oge, %140, %141 : vector<2x128xf32>
    %c0_84 = arith.constant 0 : index
    %c0_85 = arith.constant 0 : index
    %143 = vector.load %arg11[%c0_84, %c0_85] : memref<1x128xf32, #tpu.memory_space<vmem>>, vector<1x128xf32>
    %144 = vector.broadcast %143 : vector<1x128xf32> to vector<2x128xf32>
    %145 = arith.mulf %140, %144 : vector<2x128xf32>
    %146 = arith.select %142, %140, %145 : vector<2x128xi1>, vector<2x128xf32>
    %c0_86 = arith.constant 0 : index
    %c0_87 = arith.constant 0 : index
    %147 = vector.load %arg12[%c0_86, %c0_87] : memref<128x128xf32, #tpu.memory_space<vmem>>, vector<128x128xf32>
    %cst_88 = arith.constant dense<0.000000e+00> : vector<2x128xf32>
    %148 = tpu.matmul %146, %147, %cst_88 {dimension_numbers = #tpu.dot_dimension_numbers<[1], [0], [0], [1], [0, 0, 1, 1], [], []>} : vector<2x128xf32>, vector<128x128xf32>, vector<2x128xf32> -> vector<2x128xf32>
    %c0_89 = arith.constant 0 : index
    %c0_90 = arith.constant 0 : index
    %149 = vector.load %arg13[%c0_89, %c0_90] : memref<1x128xf32, #tpu.memory_space<vmem>>, vector<1x128xf32>
    %150 = vector.broadcast %149 : vector<1x128xf32> to vector<2x128xf32>
    %151 = arith.addf %148, %150 : vector<2x128xf32>
    %152 = vector.extract_strided_slice %151 {offsets = [0, 0], sizes = [2, 10], strides = [1, 1]} : vector<2x128xf32> to vector<2x10xf32>
    %c0_91 = arith.constant 0 : index
    %c0_92 = arith.constant 0 : index
    %153 = vector.load %arg14[%c0_91, %c0_92] : memref<2x10xf32, #tpu.memory_space<vmem>>, vector<2x10xf32>
    tpu.vector_store %arg14[%c0_91, %c0_92], %152 {strides = array<i32>} : memref<2x10xf32, #tpu.memory_space<vmem>>, vector<2x10xf32>,
    return
  }
  func.func @transform_0(%arg0: i32) -> (i32, i32, i32) {
    %c0_i32 = arith.constant 0 : i32
    %c0_i32_0 = arith.constant 0 : i32
    %c0_i32_1 = arith.constant 0 : i32
    %c0_i32_2 = arith.constant 0 : i32
    return %c0_i32, %c0_i32_0, %c0_i32_1 : i32, i32, i32
  }
  func.func @transform_1(%arg0: i32) -> (i32, i32) {
    %c0_i32 = arith.constant 0 : i32
    %c0_i32_0 = arith.constant 0 : i32
    %c0_i32_1 = arith.constant 0 : i32
    return %c0_i32, %c0_i32_0 : i32, i32
  }
  func.func @transform_2(%arg0: i32) -> (i32, i32) {
    %c0_i32 = arith.constant 0 : i32
    %c0_i32_0 = arith.constant 0 : i32
    %c0_i32_1 = arith.constant 0 : i32
    return %c0_i32, %c0_i32_0 : i32, i32
  }
  func.func @transform_3(%arg0: i32) -> (i32, i32) {
    %c0_i32 = arith.constant 0 : i32
    %c0_i32_0 = arith.constant 0 : i32
    %c0_i32_1 = arith.constant 0 : i32
    return %c0_i32, %c0_i32_0 : i32, i32
  }
  func.func @transform_4(%arg0: i32) -> (i32, i32) {
    %c0_i32 = arith.constant 0 : i32
    %c0_i32_0 = arith.constant 0 : i32
    %c0_i32_1 = arith.constant 0 : i32
    return %c0_i32, %c0_i32_0 : i32, i32
  }
  func.func @transform_5(%arg0: i32) -> (i32, i32) {
    %c0_i32 = arith.constant 0 : i32
    %c0_i32_0 = arith.constant 0 : i32
    %c0_i32_1 = arith.constant 0 : i32
    return %c0_i32, %c0_i32_0 : i32, i32
  }
  func.func @transform_6(%arg0: i32) -> (i32, i32) {
    %c0_i32 = arith.constant 0 : i32
    %c0_i32_0 = arith.constant 0 : i32
    %c0_i32_1 = arith.constant 0 : i32
    return %c0_i32, %c0_i32_0 : i32, i32
  }
  func.func @transform_7(%arg0: i32) -> (i32, i32) {
    %c0_i32 = arith.constant 0 : i32
    %c0_i32_0 = arith.constant 0 : i32
    %c0_i32_1 = arith.constant 0 : i32
    return %c0_i32, %c0_i32_0 : i32, i32
  }
  func.func @transform_8(%arg0: i32) -> (i32, i32) {
    %c0_i32 = arith.constant 0 : i32
    %c0_i32_0 = arith.constant 0 : i32
    %c0_i32_1 = arith.constant 0 : i32
    return %c0_i32, %c0_i32_0 : i32, i32
  }
  func.func @transform_9(%arg0: i32) -> (i32, i32) {
    %c0_i32 = arith.constant 0 : i32
    %c0_i32_0 = arith.constant 0 : i32
    %c0_i32_1 = arith.constant 0 : i32
    return %c0_i32, %c0_i32_0 : i32, i32
  }
  func.func @transform_10(%arg0: i32) -> (i32, i32) {
    %c0_i32 = arith.constant 0 : i32
    %c0_i32_0 = arith.constant 0 : i32
    %c0_i32_1 = arith.constant 0 : i32
    return %c0_i32, %c0_i32_0 : i32, i32
  }
  func.func @transform_11(%arg0: i32) -> (i32, i32) {
    %c0_i32 = arith.constant 0 : i32
    %c0_i32_0 = arith.constant 0 : i32
    %c0_i32_1 = arith.constant 0 : i32
    return %c0_i32, %c0_i32_0 : i32, i32
  }
  func.func @transform_12(%arg0: i32) -> (i32, i32) {
    %c0_i32 = arith.constant 0 : i32
    %c0_i32_0 = arith.constant 0 : i32
    %c0_i32_1 = arith.constant 0 : i32
    return %c0_i32, %c0_i32_0 : i32, i32
  }
  func.func @transform_13(%arg0: i32) -> (i32, i32) {
    %c0_i32 = arith.constant 0 : i32
    %c0_i32_0 = arith.constant 0 : i32
    %c0_i32_1 = arith.constant 0 : i32
    return %c0_i32, %c0_i32_0 : i32, i32
  }
}

</mosaic_0001>

<bundles_post_ra>
// kernel: dam_general_forward.2
= control target key start
LH: loop header
LB: loop body
LE: loop exit
PB: predicated region body
PF: predicated region fallthrough
CT: control target
= control target key end

     0   :  { %vm35_vm0 = vcmask 1040384   ;;  %vm31_vm1 = vcmask 203776   ;;  %vm484_vm2 = vcmask 62464   ;;  %s853_s0 = inlined_call_operand.vmem [shape: f32[4,25,392], index: 0, kind: input, shape index: {}]   ;;  %s854_s1 = inlined_call_operand.vmem [shape: f32[6,25], index: 1, kind: input, shape index: {}]   ;;  %s855_s2 = inlined_call_operand.vmem [shape: f32[6,1], index: 2, kind: input, shape index: {}]   ;;  %s856_s3 = inlined_call_operand.vmem [shape: f32[6,392], index: 3, kind: output, shape index: {}]  }
   0x1   :  { %v27_v0 = vld [vmem:[%s853_s0 + $0x60] sm:$0x1]  ;;  %v28_v1 = vld [vmem:[%s853_s0 + $0x68] sm:$0x1]  ;;  %v29_v2 = vld [vmem:[%s853_s0 + $0x70] sm:$0x1] }
   0x2   :  { %490 = vmatpush.msk.msra.mxu0 %vm35_vm0, %v27_v0  ;;  %492 = vmatpush.msk.msra.mxu1 %vm35_vm0, %v28_v1  ;;  %v30_v3 = vld [vmem:[%s853_s0 + $0x78] sm:$0x1]  ;;  %v23_v4 = vld [vmem:[%s853_s0 + $0x40] sm:$0xff]  ;;  %v24_v5 = vld [vmem:[%s853_s0 + $0x48] sm:$0xff] }
   0x3   :  { %494 = vmatpush.msk.msra.mxu2 %vm35_vm0, %v29_v2  ;;  %496 = vmatpush.msk.msra.mxu3 %vm35_vm0, %v30_v3  ;;  %v25_v6 = vld [vmem:[%s853_s0 + $0x50] sm:$0xff]  ;;  %v26_v7 = vld [vmem:[%s853_s0 + $0x58] sm:$0xff]  ;;  %v19_v8 = vld [vmem:[%s853_s0 + $0x20] sm:$0xff]  ;;  %v572_v2 = vmov 0  }
   0x4   :  { %61 = vmatpush.msra.mxu0 %v23_v4  ;;  %81 = vmatpush.msra.mxu1 %v24_v5  ;;  %v20_v9 = vld [vmem:[%s853_s0 + $0x28] sm:$0xff]  ;;  %v21_v10 = vld [vmem:[%s853_s0 + $0x30] sm:$0xff]  ;;  %v22_v11 = vld [vmem:[%s853_s0 + $0x38] sm:$0xff] }
   0x5   :  { %101 = vmatpush.msra.mxu2 %v25_v6  ;;  %121 = vmatpush.msra.mxu3 %v26_v7  ;;  %v15_v12 = vld [vmem:[%s853_s0] sm:$0xff]  ;;  %v16_v13 = vld [vmem:[%s853_s0 + $0x8] sm:$0xff]  ;;  %v17_v14 = vld [vmem:[%s853_s0 + $0x10] sm:$0xff] }
   0x6   :  { %62 = vmatpush.msra.mxu0 %v19_v8  ;;  %82 = vmatpush.msra.mxu1 %v20_v9  ;;  %v18_v15 = vld [vmem:[%s853_s0 + $0x18] sm:$0xff]  ;;  %v648_v16 = vld [vmem:[%s854_s1] sm:$0x3f]  ;;  %v512_v17 = vld [vmem:[%s853_s0 + $0xf0] sm:$0x1] }
   0x7   :  { %102 = vmatpush.msra.mxu2 %v21_v10  ;;  %122 = vmatpush.msra.mxu3 %v22_v11  ;;  %v513_v18 = vld [vmem:[%s853_s0 + $0xf8] sm:$0x1]  ;;  %v510_v19 = vld [vmem:[%s853_s0 + $0xe0] sm:$0x1]  ;;  %v511_v20 = vld [vmem:[%s853_s0 + $0xe8] sm:$0x1] }
   0x8   :  { %63 = vmatpush.msra.mxu0 %v15_v12  ;;  %83 = vmatpush.msra.mxu1 %v16_v13  ;;  %v508_v21 = vld [vmem:[%s853_s0 + $0xd0] sm:$0xff]  ;;  %v509_v22 = vld [vmem:[%s853_s0 + $0xd8] sm:$0xff]  ;;  %v506_v23 = vld [vmem:[%s853_s0 + $0xc0] sm:$0xff] }
   0x9   :  { %103 = vmatpush.msra.mxu2 %v17_v14  ;;  %123 = vmatpush.msra.mxu3 %v18_v15  ;;  %v507_v24 = vld [vmem:[%s853_s0 + $0xc8] sm:$0xff]  ;;  %v504_v25 = vld [vmem:[%s853_s0 + $0xb0] sm:$0xff]  ;;  %v505_v26 = vld [vmem:[%s853_s0 + $0xb8] sm:$0xff] }
   0xa   :  { %491 = vmatmul.msk.f32.vlgmr.msra.gmra.mxu0 %vm31_vm1, %v648_v16  ;;  %493 = vmatmul.msk.f32.vlgmr.msra.gmra.mxu1 %vm31_vm1, %v648_v16  ;;  %v502_v27 = vld [vmem:[%s853_s0 + $0xa0] sm:$0xff]  ;;  %v503_v28 = vld [vmem:[%s853_s0 + $0xa8] sm:$0xff]  ;;  %v500_v29 = vld [vmem:[%s853_s0 + $0x90] sm:$0xff] }
   0xb   :  { %495 = vmatmul.msk.f32.vlgmr.msra.gmra.mxu2 %vm31_vm1, %v648_v16  ;;  %497 = vmatmul.msk.f32.vlgmr.msra.gmra.mxu3 %vm31_vm1, %v648_v16  ;;  %v501_v30 = vld [vmem:[%s853_s0 + $0x98] sm:$0xff]  ;;  %v498_v31 = vld [vmem:[%s853_s0 + $0x80] sm:$0xff]  ;;  %v499_v32 = vld [vmem:[%s853_s0 + $0x88] sm:$0xff] }
   0xc   :  { %518 = vmatpush.msk.msrb.mxu2 %vm35_vm0, %v512_v17  ;;  %520 = vmatpush.msk.msrb.mxu3 %vm35_vm0, %v513_v18  ;;  %v536_v33 = vld [vmem:[%s853_s0 + $0x170] sm:$0x1]  ;;  %v537_v34 = vld [vmem:[%s853_s0 + $0x178] sm:$0x1]  ;;  %v534_v35 = vld [vmem:[%s853_s0 + $0x160] sm:$0x1] }
   0xd   :  { %514 = vmatpush.msk.msrb.mxu0 %vm35_vm0, %v510_v19  ;;  %516 = vmatpush.msk.msrb.mxu1 %vm35_vm0, %v511_v20  ;;  %v535_v36 = vld [vmem:[%s853_s0 + $0x168] sm:$0x1]  ;;  %v532_v37 = vld [vmem:[%s853_s0 + $0x150] sm:$0xff]  ;;  %v533_v38 = vld [vmem:[%s853_s0 + $0x158] sm:$0xff] }
   0xe   :  { %210 = vmatpush.msrb.mxu2 %v508_v21  ;;  %230 = vmatpush.msrb.mxu3 %v509_v22  ;;  %v530_v39 = vld [vmem:[%s853_s0 + $0x140] sm:$0xff]  ;;  %v531_v40 = vld [vmem:[%s853_s0 + $0x148] sm:$0xff]  ;;  %v528_v41 = vld [vmem:[%s853_s0 + $0x130] sm:$0xff] }
   0xf   :  { %170 = vmatpush.msrb.mxu0 %v506_v23  ;;  %190 = vmatpush.msrb.mxu1 %v507_v24  ;;  %v529_v42 = vld [vmem:[%s853_s0 + $0x138] sm:$0xff]  ;;  %v526_v43 = vld [vmem:[%s853_s0 + $0x120] sm:$0xff]  ;;  %v527_v44 = vld [vmem:[%s853_s0 + $0x128] sm:$0xff] }
  0x10   :  { %211 = vmatpush.msrb.mxu2 %v504_v25  ;;  %231 = vmatpush.msrb.mxu3 %v505_v26  ;;  %v524_v45 = vld [vmem:[%s853_s0 + $0x110] sm:$0xff]  ;;  %v525_v46 = vld [vmem:[%s853_s0 + $0x118] sm:$0xff]  ;;  %v522_v47 = vld [vmem:[%s853_s0 + $0x100] sm:$0xff] }
  0x11   :  { %171 = vmatpush.msrb.mxu0 %v502_v27  ;;  %191 = vmatpush.msrb.mxu1 %v503_v28  ;;  %v523_v48 = vld [vmem:[%s853_s0 + $0x108] sm:$0xff]  ;;  %v560_v49 = vld [vmem:[%s853_s0 + $0x1f0] sm:$0x1]  ;;  %v561_v50 = vld [vmem:[%s853_s0 + $0x1f8] sm:$0x1] }
  0x12   :  { %212 = vmatpush.msrb.mxu2 %v500_v29  ;;  %232 = vmatpush.msrb.mxu3 %v501_v30  ;;  %v558_v51 = vld [vmem:[%s853_s0 + $0x1e0] sm:$0x1]  ;;  %v559_v52 = vld [vmem:[%s853_s0 + $0x1e8] sm:$0x1]  ;;  %v556_v53 = vld [vmem:[%s853_s0 + $0x1d0] sm:$0xff] }
  0x13   :  { %172 = vmatpush.msrb.mxu0 %v498_v31  ;;  %192 = vmatpush.msrb.mxu1 %v499_v32  ;;  %v557_v54 = vld [vmem:[%s853_s0 + $0x1d8] sm:$0xff]  ;;  %v554_v55 = vld [vmem:[%s853_s0 + $0x1c0] sm:$0xff]  ;;  %v555_v56 = vld [vmem:[%s853_s0 + $0x1c8] sm:$0xff] }
  0x14   :  { %515 = vmatmul.msk.f32.vlgmr.msrb.gmra.mxu0 %vm31_vm1, %v648_v16  ;;  %517 = vmatmul.msk.f32.vlgmr.msrb.gmra.mxu1 %vm31_vm1, %v648_v16  ;;  %v552_v57 = vld [vmem:[%s853_s0 + $0x1b0] sm:$0xff]  ;;  %v553_v58 = vld [vmem:[%s853_s0 + $0x1b8] sm:$0xff]  ;;  %v550_v59 = vld [vmem:[%s853_s0 + $0x1a0] sm:$0xff] }
  0x15   :  { %519 = vmatmul.msk.f32.vlgmr.msrb.gmra.mxu2 %vm31_vm1, %v648_v16  ;;  %521 = vmatmul.msk.f32.vlgmr.msrb.gmra.mxu3 %vm31_vm1, %v648_v16  ;;  %v551_v60 = vld [vmem:[%s853_s0 + $0x1a8] sm:$0xff]  ;;  %v548_v61 = vld [vmem:[%s853_s0 + $0x190] sm:$0xff]  ;;  %v549_v62 = vld [vmem:[%s853_s0 + $0x198] sm:$0xff] }
  0x16   :  { %542 = vmatpush.msk.msra.mxu2 %vm35_vm0, %v536_v33  ;;  %544 = vmatpush.msk.msra.mxu3 %vm35_vm0, %v537_v34  ;;  %v546_v63 = vld [vmem:[%s853_s0 + $0x180] sm:$0xff]  ;;  %v547_v0 = vld [vmem:[%s853_s0 + $0x188] sm:$0xff] }
  0x17   :  { %538 = vmatpush.msk.msra.mxu0 %vm35_vm0, %v534_v35  ;;  %540 = vmatpush.msk.msra.mxu1 %vm35_vm0, %v535_v36  ;;  %v467_v1 = vld [vmem:[%s855_s2] sm:$0x3f] }
  0x18   :  { %323 = vmatpush.msra.mxu2 %v532_v37  ;;  %343 = vmatpush.msra.mxu3 %v533_v38 }
  0x19   :  { %283 = vmatpush.msra.mxu0 %v530_v39  ;;  %303 = vmatpush.msra.mxu1 %v531_v40 }
  0x1a   :  { %324 = vmatpush.msra.mxu2 %v528_v41  ;;  %344 = vmatpush.msra.mxu3 %v529_v42 }
  0x1b   :  { %284 = vmatpush.msra.mxu0 %v526_v43  ;;  %304 = vmatpush.msra.mxu1 %v527_v44 }
  0x1c   :  { %325 = vmatpush.msra.mxu2 %v524_v45  ;;  %345 = vmatpush.msra.mxu3 %v525_v46 }
  0x1d   :  { %285 = vmatpush.msra.mxu0 %v522_v47  ;;  %305 = vmatpush.msra.mxu1 %v523_v48 }
  0x1e   :  { %539 = vmatmul.msk.f32.vlgmr.msra.gmra.mxu0 %vm31_vm1, %v648_v16  ;;  %541 = vmatmul.msk.f32.vlgmr.msra.gmra.mxu1 %vm31_vm1, %v648_v16 }
  0x1f   :  { %543 = vmatmul.msk.f32.vlgmr.msra.gmra.mxu2 %vm31_vm1, %v648_v16  ;;  %545 = vmatmul.msk.f32.vlgmr.msra.gmra.mxu3 %vm31_vm1, %v648_v16 }
  0x20   :  { %566 = vmatpush.msk.msrb.mxu2 %vm35_vm0, %v560_v49  ;;  %568 = vmatpush.msk.msrb.mxu3 %vm35_vm0, %v561_v50 }
  0x21   :  { %562 = vmatpush.msk.msrb.mxu0 %vm35_vm0, %v558_v51  ;;  %564 = vmatpush.msk.msrb.mxu1 %vm35_vm0, %v559_v52 }
  0x22   :  { %436 = vmatpush.msrb.mxu2 %v556_v53  ;;  %456 = vmatpush.msrb.mxu3 %v557_v54 }
  0x23   :  { %396 = vmatpush.msrb.mxu0 %v554_v55  ;;  %416 = vmatpush.msrb.mxu1 %v555_v56 }
  0x24   :  { %437 = vmatpush.msrb.mxu2 %v552_v57  ;;  %457 = vmatpush.msrb.mxu3 %v553_v58 }
  0x25   :  { %397 = vmatpush.msrb.mxu0 %v550_v59  ;;  %417 = vmatpush.msrb.mxu1 %v551_v60 }
  0x26   :  { %438 = vmatpush.msrb.mxu2 %v548_v61  ;;  %458 = vmatpush.msrb.mxu3 %v549_v62 }
  0x27   :  { %398 = vmatpush.msrb.mxu0 %v546_v63  ;;  %418 = vmatpush.msrb.mxu1 %v547_v0 }
  0x28   :  { %563 = vmatmul.msk.f32.vlgmr.msrb.gmra.mxu0 %vm31_vm1, %v648_v16  ;;  %565 = vmatmul.msk.f32.vlgmr.msrb.gmra.mxu1 %vm31_vm1, %v648_v16 }
  0x29   :  { %567 = vmatmul.msk.f32.vlgmr.msrb.gmra.mxu2 %vm31_vm1, %v648_v16  ;;  %569 = vmatmul.msk.f32.vlgmr.msrb.gmra.mxu3 %vm31_vm1, %v648_v16 }
  0x2a   :  { %571 = vset.pattern.permute.xlu0 %v572_v2 }
  0x2b   :  { %470 = vperm.xlu0 %571, %v467_v1  }
  0x87   :  { %v65_v3 = vpop.f32.mrf.mxu0  ;;  %v85_v4 = vpop.f32.mrf.mxu1 }
  0x8e   :  { %v105_v5 = vpop.f32.mrf.mxu2  ;;  %v125_v6 = vpop.f32.mrf.mxu3 }
  0x91   :  { %v174_v7 = vpop.f32.mrf.mxu0  ;;  %v194_v8 = vpop.f32.mrf.mxu1 }
  0x92   :  { %v237_v13 = vmax.f32 %v65_v3, %v174_v7  ;;  %v238_v14 = vmax.f32 %v85_v4, %v194_v8 }
  0x98   :  { %v214_v9 = vpop.f32.mrf.mxu2  ;;  %v234_v10 = vpop.f32.mrf.mxu3 }
  0x99   :  { %v239_v26 = vmax.f32 %v105_v5, %v214_v9  ;;  %v240_v27 = vmax.f32 %v125_v6, %v234_v10 }
  0x9b   :  { %v287_v11 = vpop.f32.mrf.mxu0  ;;  %v307_v12 = vpop.f32.mrf.mxu1 }
  0x9c   :  { %v350_v18 = vmax.f32 %v237_v13, %v287_v11  ;;  %v351_v19 = vmax.f32 %v238_v14, %v307_v12 }
  0x9d   :  { %v471_v16 = vpop.permute.xlu0 %470 }
  0xa2   :  { %v327_v15 = vpop.f32.mrf.mxu2  ;;  %v347_v17 = vpop.f32.mrf.mxu3 }
  0xa3   :  { %v352_v30 = vmax.f32 %v239_v26, %v327_v15  ;;  %v353_v31 = vmax.f32 %v240_v27, %v347_v17 }
  0xa5   :  { %v400_v20 = vpop.f32.mrf.mxu0  ;;  %v420_v21 = vpop.f32.mrf.mxu1 }
  0xa6   :  { %v463_v22 = vmax.f32 %v350_v18, %v400_v20  ;;  %v464_v23 = vmax.f32 %v351_v19, %v420_v21 }
  0xa8   :  { %v473_v24 = vadd.f32 %v471_v16, %v463_v22  ;;  %v474_v25 = vadd.f32 %v471_v16, %v464_v23 }
  0xaa   :  { %v477_v28 = vmax.f32 %v473_v24, 0.0  ;;  %v478_v29 = vmax.f32 %v474_v25, 0.0 }
  0xac   :  { %481 = vst [vmem:[%s856_s3] sm:$0x3f] %v477_v28  ;;  %v440_v32 = vpop.f32.mrf.mxu2  ;;  %v460_v33 = vpop.f32.mrf.mxu3 }
  0xad   :  { %482 = vst [vmem:[%s856_s3 + $0x8] sm:$0x3f] %v478_v29  ;;  %v465_v34 = vmax.f32 %v352_v30, %v440_v32  ;;  %v466_v35 = vmax.f32 %v353_v31, %v460_v33 }
  0xaf   :  { %v475_v36 = vadd.f32 %v471_v16, %v465_v34  ;;  %v476_v37 = vadd.f32 %v471_v16, %v466_v35 }
  0xb1   :  { %v479_v38 = vmax.f32 %v475_v36, 0.0  ;;  %v480_v39 = vmax.f32 %v476_v37, 0.0 }
  0xb3   :  { %483 = vst [vmem:[%s856_s3 + $0x10] sm:$0x3f] %v479_v38 }
  0xb4   :  { %485 = vst.msk [vmem:[%s856_s3 + $0x18] sm:$0x3f] %vm484_vm2, %v480_v39 }

// kernel: dam_general_forward.3
= control target key start
LH: loop header
LB: loop body
LE: loop exit
PB: predicated region body
PF: predicated region fallthrough
CT: control target
= control target key end

     0   :  { %vm100_vm0 = vcmask 1045504   ;;  %vm78_vm1 = vcmask 179200   ;;  %s2358_s0 = inlined_call_operand.vmem [shape: f32[4,50,150], index: 0, kind: input, shape index: {}]   ;;  %s2359_s1 = inlined_call_operand.vmem [shape: f32[150,16], index: 1, kind: input, shape index: {}]   ;;  %s2360_s2 = inlined_call_operand.vmem [shape: f32[1,16], index: 2, kind: input, shape index: {}]   ;;  %s2361_s3 = inlined_call_operand.vmem [shape: f32[400,128], index: 3, kind: input, shape index: {}]   ;;  %s2362_s4 = inlined_call_operand.vmem [shape: f32[1,128], index: 4, kind: input, shape index: {}]   ;;  %s2363_s5 = inlined_call_operand.vmem [shape: f32[128,128], index: 5, kind: input, shape index: {}]   ;;  %s2364_s6 = inlined_call_operand.vmem [shape: f32[1,128], index: 6, kind: input, shape index: {}]   ;;  %s2365_s7 = inlined_call_operand.vmem [shape: f32[1,128], index: 7, kind: input, shape index: {}]   ;;  %s2366_s8 = inlined_call_operand.vmem [shape: f32[128,128], index: 8, kind: input, shape index: {}]   ;;  %s2367_s9 = inlined_call_operand.vmem [shape: f32[1,128], index: 9, kind: input, shape index: {}]   ;;  %s2368_s10 = inlined_call_operand.vmem [shape: f32[1,128], index: 10, kind: input, shape index: {}]   ;;  %s2369_s11 = inlined_call_operand.vmem [shape: f32[128,128], index: 11, kind: input, shape index: {}]   ;;  %s2370_s12 = inlined_call_operand.vmem [shape: f32[1,128], index: 12, kind: input, shape index: {}]   ;;  %s2371_s13 = inlined_call_operand.hbm [shape: f32[2,10], index: 13, kind: output, shape index: {}]  }
   0x1   :  { %v1569_v0 = vld [vmem:[%s2359_s1 + $0x78] sm:$0xff]  ;;  %v1574_v1 = vld [vmem:[%s2359_s1 + $0x90] sm:$0x3f]  ;;  %v1587_v3 = vld [vmem:[%s2359_s1 + $0x88] sm:$0xff] }
   0x2   :  { %v1579_v2 = vld [vmem:[%s2359_s1 + $0x70] sm:$0xff]  ;;  %216 = vmatpush.msra.mxu2 %v1569_v0  ;;  %1384 = vmatpush.msk.msra.mxu3 %vm100_vm0, %v1574_v1  ;;  %v1593_v4 = vld [vmem:[%s2359_s1 + $0x68] sm:$0xff]  ;;  %v1598_v5 = vld [vmem:[%s2359_s1 + $0x80] sm:$0xff] }
   0x3   :  { %104 = vmatpush.msra.mxu0 %v1569_v0  ;;  %1362 = vmatpush.msk.msra.mxu1 %vm100_vm0, %v1574_v1  ;;  %v1371_v6 = vld [vmem:[%s2358_s0 + $0x78] sm:$0xff]  ;;  %v1611_v7 = vld [vmem:[%s2359_s1 + $0x60] sm:$0xff]  ;;  %v65_v8 = vld [vmem:[%s2358_s0 + $0x8] sm:$0xff] }
   0x4   :  { %217 = vmatpush.msra.mxu2 %v1579_v2  ;;  %268 = vmatpush.msra.mxu3 %v1587_v3  ;;  %v1624_v9 = vld [vmem:[%s2359_s1 + $0x58] sm:$0xff]  ;;  %v1632_v10 = vld [vmem:[%s2359_s1 + $0x50] sm:$0xff]  ;;  %v1642_v11 = vld [vmem:[%s2359_s1 + $0x48] sm:$0xff] }
   0x5   :  { %105 = vmatpush.msra.mxu0 %v1579_v2  ;;  %156 = vmatpush.msra.mxu1 %v1587_v3  ;;  %v1373_v12 = vld [vmem:[%s2358_s0 + $0x88] sm:$0xff]  ;;  %v1650_v13 = vld [vmem:[%s2359_s1 + $0x40] sm:$0xff]  ;;  %v67_v14 = vld [vmem:[%s2358_s0 + $0x18] sm:$0xff] }
   0x6   :  { %218 = vmatpush.msra.mxu2 %v1593_v4  ;;  %269 = vmatpush.msra.mxu3 %v1598_v5 }
   0x7   :  { %1385 = vmatmul.msk.f32.vlgmr.msra.gmra.mxu3 %vm78_vm1, %v1371_v6  ;;  %106 = vmatpush.msra.mxu0 %v1593_v4 }
   0x8   :  { %219 = vmatpush.msra.mxu2 %v1611_v7  ;;  %157 = vmatpush.msra.mxu1 %v1598_v5 }
   0x9   :  { %107 = vmatpush.msra.mxu0 %v1611_v7  ;;  %1363 = vmatmul.msk.f32.vlgmr.msra.gmra.mxu1 %vm78_vm1, %v65_v8 }
   0xa   :  { %220 = vmatpush.msra.mxu2 %v1624_v9  ;;  %1406 = vmatpush.msk.msrb.mxu3 %vm100_vm0, %v1574_v1 }
   0xb   :  { %108 = vmatpush.msra.mxu0 %v1624_v9  ;;  %335 = vmatpush.msrb.mxu1 %v1569_v0 }
   0xc   :  { %221 = vmatpush.msra.mxu2 %v1632_v10  ;;  %387 = vmatpush.msrb.mxu3 %v1587_v3 }
   0xd   :  { %109 = vmatpush.msra.mxu0 %v1632_v10  ;;  %336 = vmatpush.msrb.mxu1 %v1579_v2 }
   0xe   :  { %222 = vmatpush.msra.mxu2 %v1642_v11  ;;  %388 = vmatpush.msrb.mxu3 %v1598_v5 }
   0xf   :  { %18 = vsyncpa [#allocation3], 0  ;;  %1386 = vmatmul.msk.f32.gmra.mxu3 %vm78_vm1, %v1373_v12  ;;  %110 = vmatpush.msra.mxu0 %v1642_v11  ;;  %v1667_v15 = vld [vmem:[%s2359_s1 + $0x38] sm:$0xff]  ;;  %v1675_v16 = vld [vmem:[%s2359_s1 + $0x30] sm:$0xff]  ;;  %vm561_vm2 = vcmask 130048   ;;  %vm1344_vm5 = vcmask 74752  }
  0x10   :  { %223 = vmatpush.msra.mxu2 %v1650_v13  ;;  %337 = vmatpush.msrb.mxu1 %v1593_v4  ;;  %v1684_v17 = vld [vmem:[%s2359_s1 + $0x28] sm:$0xff]  ;;  %v1375_v18 = vld [vmem:[%s2358_s0 + $0x98] sm:$0xff]  ;;  %v1695_v19 = vld [vmem:[%s2359_s1 + $0x20] sm:$0xff] }
  0x11   :  { %111 = vmatpush.msra.mxu0 %v1650_v13  ;;  %1364 = vmatmul.msk.f32.gmra.mxu1 %vm78_vm1, %v67_v14  ;;  %v69_v20 = vld [vmem:[%s2358_s0 + $0x28] sm:$0xff]  ;;  %v1707_v21 = vld [vmem:[%s2359_s1 + $0x18] sm:$0xff]  ;;  %v1715_v22 = vld [vmem:[%s2359_s1 + $0x10] sm:$0xff] }
  0x12   :  { %224 = vmatpush.msra.mxu2 %v1667_v15  ;;  %338 = vmatpush.msrb.mxu1 %v1611_v7  ;;  %v1724_v23 = vld [vmem:[%s2359_s1 + $0x8] sm:$0xff]  ;;  %v1735_v25 = vld [vmem:[%s2359_s1] sm:$0xff]  ;;  %v1370_v26 = vld [vmem:[%s2358_s0 + $0x70] sm:$0xff] }
  0x13   :  { %112 = vmatpush.msra.mxu0 %v1667_v15  ;;  %v1377_v24 = vld [vmem:[%s2358_s0 + $0xa8] sm:$0xff]  ;;  %v64_v27 = vld [vmem:[%s2358_s0] sm:$0xff]  ;;  %v71_v28 = vld [vmem:[%s2358_s0 + $0x38] sm:$0xff] }
  0x14   :  { %225 = vmatpush.msra.mxu2 %v1675_v16  ;;  %339 = vmatpush.msrb.mxu1 %v1624_v9  ;;  %v1379_v29 = vld [vmem:[%s2358_s0 + $0xb8] sm:$0xff]  ;;  %v1372_v30 = vld [vmem:[%s2358_s0 + $0x80] sm:$0xff]  ;;  %v66_v31 = vld [vmem:[%s2358_s0 + $0x10] sm:$0xff] }
  0x15   :  { %113 = vmatpush.msra.mxu0 %v1675_v16  ;;  %v73_v32 = vld [vmem:[%s2358_s0 + $0x48] sm:$0xff]  ;;  %v1374_v34 = vld [vmem:[%s2358_s0 + $0x90] sm:$0xff]  ;;  %v68_v35 = vld [vmem:[%s2358_s0 + $0x20] sm:$0xff] }
  0x16   :  { %226 = vmatpush.msra.mxu2 %v1684_v17  ;;  %340 = vmatpush.msrb.mxu1 %v1632_v10  ;;  %v1381_v33 = vld [vmem:[%s2358_s0 + $0xc8] sm:$0xff]  ;;  %v75_v36 = vld [vmem:[%s2358_s0 + $0x58] sm:$0xff]  ;;  %v1376_v38 = vld [vmem:[%s2358_s0 + $0xa0] sm:$0xff] }
  0x17   :  { %1387 = vmatmul.msk.f32.gmra.mxu3 %vm78_vm1, %v1375_v18  ;;  %114 = vmatpush.msra.mxu0 %v1684_v17  ;;  %v1383_v37 = vld [vmem:[%s2358_s0 + $0xd8] sm:$0x3]  ;;  %v70_v39 = vld [vmem:[%s2358_s0 + $0x30] sm:$0xff]  ;;  %v77_v40 = vld [vmem:[%s2358_s0 + $0x68] sm:$0x3] }
  0x18   :  { %227 = vmatpush.msra.mxu2 %v1695_v19  ;;  %341 = vmatpush.msrb.mxu1 %v1642_v11  ;;  %v1393_v41 = vld [vmem:[%s2358_s0 + $0xe8] sm:$0xff]  ;;  %v1378_v42 = vld [vmem:[%s2358_s0 + $0xb0] sm:$0xff]  ;;  %v72_v43 = vld [vmem:[%s2358_s0 + $0x40] sm:$0xff] }
  0x19   :  { %115 = vmatpush.msra.mxu0 %v1695_v19  ;;  %1365 = vmatmul.msk.f32.gmra.mxu1 %vm78_vm1, %v69_v20  ;;  %v1392_v44 = vld [vmem:[%s2358_s0 + $0xe0] sm:$0xff]  ;;  %v1395_v45 = vld [vmem:[%s2358_s0 + $0xf8] sm:$0xff]  ;;  %v74_v47 = vld [vmem:[%s2358_s0 + $0x50] sm:$0xff] }
  0x1a   :  { %228 = vmatpush.msra.mxu2 %v1707_v21  ;;  %342 = vmatpush.msrb.mxu1 %v1650_v13  ;;  %v1380_v46 = vld [vmem:[%s2358_s0 + $0xc0] sm:$0xff]  ;;  %v1394_v48 = vld [vmem:[%s2358_s0 + $0xf0] sm:$0xff]  ;;  %v1397_v49 = vld [vmem:[%s2358_s0 + $0x108] sm:$0xff] }
  0x1b   :  { %116 = vmatpush.msra.mxu0 %v1707_v21  ;;  %v1382_v50 = vld [vmem:[%s2358_s0 + $0xd0] sm:$0x3]  ;;  %v76_v51 = vld [vmem:[%s2358_s0 + $0x60] sm:$0x3]  ;;  %v1399_v53 = vld [vmem:[%s2358_s0 + $0x118] sm:$0xff] }
  0x1c   :  { %229 = vmatpush.msra.mxu2 %v1715_v22  ;;  %343 = vmatpush.msrb.mxu1 %v1667_v15  ;;  %v1396_v52 = vld [vmem:[%s2358_s0 + $0x100] sm:$0xff]  ;;  %v1415_v54 = vld [vmem:[%s2358_s0 + $0x158] sm:$0xff]  ;;  %v1414_v55 = vld [vmem:[%s2358_s0 + $0x150] sm:$0xff] }
  0x1d   :  { %117 = vmatpush.msra.mxu0 %v1715_v22  ;;  %v1398_v56 = vld [vmem:[%s2358_s0 + $0x110] sm:$0xff]  ;;  %v1401_v57 = vld [vmem:[%s2358_s0 + $0x128] sm:$0xff]  ;;  %v1416_v59 = vld [vmem:[%s2358_s0 + $0x160] sm:$0xff] }
  0x1e   :  { %230 = vmatpush.msra.mxu2 %v1724_v23  ;;  %344 = vmatpush.msrb.mxu1 %v1675_v16  ;;  %v1417_v58 = vld [vmem:[%s2358_s0 + $0x168] sm:$0xff]  ;;  %v1400_v60 = vld [vmem:[%s2358_s0 + $0x120] sm:$0xff]  ;;  %v1403_v61 = vld [vmem:[%s2358_s0 + $0x138] sm:$0xff] }
  0x1f   :  { %1388 = vmatmul.msk.f32.gmra.mxu3 %vm78_vm1, %v1377_v24  ;;  %118 = vmatpush.msra.mxu0 %v1724_v23  ;;  %v1419_v62 = vld [vmem:[%s2358_s0 + $0x178] sm:$0xff]  ;;  %v1418_v63 = vld [vmem:[%s2358_s0 + $0x170] sm:$0xff]  ;;  %v1424_v8 = vld [vmem:[%s2358_s0 + $0x1a0] sm:$0xff] }
  0x20   :  { %231 = vmatpush.msra.mxu2 %v1735_v25  ;;  %345 = vmatpush.msrb.mxu1 %v1684_v17  ;;  %v1422_v6 = vld [vmem:[%s2358_s0 + $0x190] sm:$0xff]  ;;  %v633_v14 = vld [vmem:[%s2361_s3 + $0x38] sm:$0xff] }
  0x21   :  { %232 = vmatmul.f32.vlgmr.msra.gmra.mxu2 %v1370_v26  ;;  %119 = vmatpush.msra.mxu0 %v1735_v25  ;;  %v789_v24 = vld [vmem:[%s2361_s3 + $0x98] sm:$0xff] }
  0x22   :  { %1428 = vmatpush.msk.msrb.mxu2 %vm100_vm0, %v1574_v1  ;;  %120 = vmatmul.f32.vlgmr.msra.gmra.mxu0 %v64_v27  ;;  %v1405_v1 = vld [vmem:[%s2358_s0 + $0x148] sm:$0x3] }
  0x23   :  { %1366 = vmatmul.msk.f32.gmra.mxu1 %vm78_vm1, %v71_v28  ;;  %454 = vmatpush.msrb.mxu0 %v1569_v0  ;;  %v1402_v0 = vld [vmem:[%s2358_s0 + $0x130] sm:$0xff] }
  0x24   :  { %506 = vmatpush.msrb.mxu2 %v1587_v3  ;;  %346 = vmatpush.msrb.mxu1 %v1695_v19  ;;  %v1420_v3 = vld [vmem:[%s2358_s0 + $0x180] sm:$0xff] }
  0x25   :  { %455 = vmatpush.msrb.mxu0 %v1579_v2  ;;  %v1421_v2 = vld [vmem:[%s2358_s0 + $0x188] sm:$0xff]  ;;  %651 = vmatpush.msra.mxu3 %v633_v14 }
  0x26   :  { %347 = vmatpush.msrb.mxu1 %v1707_v21  ;;  %507 = vmatpush.msrb.mxu2 %v1598_v5  ;;  %v1423_v5 = vld [vmem:[%s2358_s0 + $0x198] sm:$0xff] }
  0x27   :  { %1389 = vmatmul.msk.f32.gmra.mxu3 %vm78_vm1, %v1379_v29  ;;  %456 = vmatpush.msrb.mxu0 %v1593_v4  ;;  %v1404_v4 = vld [vmem:[%s2358_s0 + $0x140] sm:$0x3]  ;;  %v632_v29 = vld [vmem:[%s2361_s3 + $0x30] sm:$0xff] }
  0x28   :  { %348 = vmatpush.msrb.mxu1 %v1715_v22  ;;  %807 = vmatpush.msra.mxu2 %v789_v24 }
  0x29   :  { %235 = vmatmul.f32.gmra.mxu2 %v1372_v30  ;;  %457 = vmatpush.msrb.mxu0 %v1611_v7  ;;  %v1425_v7 = vld [vmem:[%s2358_s0 + $0x1a8] sm:$0xff] }
  0x2a   :  { %123 = vmatmul.f32.gmra.mxu0 %v66_v31  ;;  %349 = vmatpush.msrb.mxu1 %v1724_v23  ;;  %v557_v31 = vld [vmem:[%s2361_s3 + $0x10] sm:$0xff] }
  0x2b   :  { %1367 = vmatmul.msk.f32.gmra.mxu1 %vm78_vm1, %v73_v32  ;;  %458 = vmatpush.msrb.mxu0 %v1624_v9  ;;  %v1427_v9 = vld [vmem:[%s2358_s0 + $0x1b8] sm:$0x3]  ;;  %v606_v32 = vld [vmem:[%s2361_s3 + $0x20] sm:$0xff] }
  0x2c   :  { %350 = vmatpush.msrb.mxu1 %v1735_v25  ;;  %652 = vmatpush.msra.mxu3 %v632_v29 }
  0x2d   :  { %459 = vmatpush.msrb.mxu0 %v1632_v10 }
  0x2f   :  { %1390 = vmatmul.msk.f32.gmra.mxu3 %vm78_vm1, %v1381_v33  ;;  %460 = vmatpush.msrb.mxu0 %v1642_v11  ;;  %v1426_v11 = vld [vmem:[%s2358_s0 + $0x1b0] sm:$0x3] }
  0x31   :  { %238 = vmatmul.f32.gmra.mxu2 %v1374_v34  ;;  %461 = vmatpush.msrb.mxu0 %v1650_v13 }
  0x32   :  { %126 = vmatmul.f32.gmra.mxu0 %v68_v35 }
  0x33   :  { %1368 = vmatmul.msk.f32.gmra.mxu1 %vm78_vm1, %v75_v36  ;;  %462 = vmatpush.msrb.mxu0 %v1667_v15  ;;  %v558_v15 = vld [vmem:[%s2361_s3 + $0x18] sm:$0xff] }
  0x35   :  { %463 = vmatpush.msrb.mxu0 %v1675_v16 }
  0x37   :  { %1391 = vmatmul.msk.f32.gmra.mxu3 %vm78_vm1, %v1383_v37  ;;  %464 = vmatpush.msrb.mxu0 %v1684_v17  ;;  %v607_v17 = vld [vmem:[%s2361_s3 + $0x28] sm:$0xff] }
  0x38   :  { %625 = vmatpush.msra.mxu1 %v607_v17 }
  0x39   :  { %241 = vmatmul.f32.gmra.mxu2 %v1376_v38  ;;  %465 = vmatpush.msrb.mxu0 %v1695_v19 }
  0x3a   :  { %129 = vmatmul.f32.gmra.mxu0 %v70_v39  ;;  %626 = vmatpush.msra.mxu1 %v606_v32 }
  0x3b   :  { %1369 = vmatmul.msk.f32.gmra.mxu1 %vm78_vm1, %v77_v40  ;;  %466 = vmatpush.msrb.mxu0 %v1707_v21 }
  0x3d   :  { %467 = vmatpush.msrb.mxu0 %v1715_v22 }
  0x3f   :  { %1407 = vmatmul.msk.f32.vlgmr.msrb.gmra.mxu3 %vm78_vm1, %v1393_v41  ;;  %468 = vmatpush.msrb.mxu0 %v1724_v23  ;;  %v788_v41 = vld [vmem:[%s2361_s3 + $0x90] sm:$0xff] }
  0x40   :  { %808 = vmatpush.msra.mxu2 %v788_v41 }
  0x41   :  { %244 = vmatmul.f32.gmra.mxu2 %v1378_v42  ;;  %469 = vmatpush.msrb.mxu0 %v1735_v25 }
  0x42   :  { %132 = vmatmul.f32.gmra.mxu0 %v72_v43 }
  0x43   :  { %351 = vmatmul.f32.vlgmr.msrb.gmra.mxu1 %v1392_v44  ;;  %578 = vmatpush.msra.mxu0 %v558_v15 }
  0x45   :  { %579 = vmatpush.msra.mxu0 %v557_v31 }
  0x47   :  { %1408 = vmatmul.msk.f32.gmra.mxu3 %vm78_vm1, %v1395_v45 }
  0x49   :  { %247 = vmatmul.f32.gmra.mxu2 %v1380_v46  ;;  %v685_v46 = vld [vmem:[%s2361_s3 + $0x58] sm:$0xff] }
  0x4a   :  { %135 = vmatmul.f32.gmra.mxu0 %v74_v47  ;;  %v556_v47 = vld [vmem:[%s2361_s3 + $0x8] sm:$0xff]  ;;  %703 = vmatpush.msrb.mxu3 %v685_v46  ;;  %v736_v46 = vld [vmem:[%s2361_s3 + $0x70] sm:$0xff] }
  0x4b   :  { %354 = vmatmul.f32.gmra.mxu1 %v1394_v48 }
  0x4f   :  { %1409 = vmatmul.msk.f32.gmra.mxu3 %vm78_vm1, %v1397_v49  ;;  %v659_v49 = vld [vmem:[%s2361_s3 + $0x48] sm:$0xff] }
  0x50   :  { %677 = vmatpush.msrb.mxu1 %v659_v49 }
  0x51   :  { %250 = vmatmul.f32.gmra.mxu2 %v1382_v50  ;;  %v684_v50 = vld [vmem:[%s2361_s3 + $0x50] sm:$0xff] }
  0x52   :  { %138 = vmatmul.f32.gmra.mxu0 %v76_v51  ;;  %704 = vmatpush.msrb.mxu3 %v684_v50  ;;  %v555_v51 = vld [vmem:[%s2361_s3] sm:$0xff] }
  0x53   :  { %357 = vmatmul.f32.gmra.mxu1 %v1396_v52  ;;  %v658_v52 = vld [vmem:[%s2361_s3 + $0x40] sm:$0xff] }
  0x54   :  { %678 = vmatpush.msrb.mxu1 %v658_v52 }
  0x57   :  { %1410 = vmatmul.msk.f32.gmra.mxu3 %vm78_vm1, %v1399_v53 }
  0x59   :  { %1429 = vmatmul.msk.f32.vlgmr.msrb.gmra.mxu2 %vm78_vm1, %v1415_v54 }
  0x5a   :  { %470 = vmatmul.f32.vlgmr.msrb.gmra.mxu0 %v1414_v55 }
  0x5b   :  { %360 = vmatmul.f32.gmra.mxu1 %v1398_v56  ;;  %600 = vmatpush.msrb.mxu0 %v556_v47 }
  0x5d   :  { %601 = vmatpush.msrb.mxu0 %v555_v51 }
  0x5f   :  { %1411 = vmatmul.msk.f32.gmra.mxu3 %vm78_vm1, %v1401_v57 }
  0x61   :  { %1430 = vmatmul.msk.f32.gmra.mxu2 %vm78_vm1, %v1417_v58 }
  0x62   :  { %473 = vmatmul.f32.gmra.mxu0 %v1416_v59 }
  0x63   :  { %363 = vmatmul.f32.gmra.mxu1 %v1400_v60 }
  0x67   :  { %1412 = vmatmul.msk.f32.gmra.mxu3 %vm78_vm1, %v1403_v61 }
  0x69   :  { %1431 = vmatmul.msk.f32.gmra.mxu2 %vm78_vm1, %v1419_v62 }
  0x6a   :  { %476 = vmatmul.f32.gmra.mxu0 %v1418_v63  ;;  %v893_v63 = vld [vmem:[%s2361_s3 + $0xd8] sm:$0xff] }
  0x6b   :  { %366 = vmatmul.f32.gmra.mxu1 %v1402_v0  ;;  %911 = vmatpush.msrb.mxu2 %v893_v63  ;;  %v840_v63 = vld [vmem:[%s2361_s3 + $0xb0] sm:$0xff] }
  0x6f   :  { %1413 = vmatmul.msk.f32.gmra.mxu3 %vm78_vm1, %v1405_v1 }
  0x71   :  { %1432 = vmatmul.msk.f32.gmra.mxu2 %vm78_vm1, %v1421_v2 }
  0x72   :  { %479 = vmatmul.f32.gmra.mxu0 %v1420_v3  ;;  %v2032_v3 = vld [vmem:[%s2360_s2] ss:$0 sm:$0xff] }
  0x73   :  { %369 = vmatmul.f32.gmra.mxu1 %v1404_v4 }
  0x79   :  { %1433 = vmatmul.msk.f32.gmra.mxu2 %vm78_vm1, %v1423_v5  ;;  %v892_v5 = vld [vmem:[%s2361_s3 + $0xd0] sm:$0xff] }
  0x7a   :  { %482 = vmatmul.f32.gmra.mxu0 %v1422_v6  ;;  %912 = vmatpush.msrb.mxu2 %v892_v5 }
  0x81   :  { %1434 = vmatmul.msk.f32.gmra.mxu2 %vm78_vm1, %v1425_v7 }
  0x82   :  { %485 = vmatmul.f32.gmra.mxu0 %v1424_v8 }
  0x86   :  { %v1933_v10 = vpop.f32.mrf.mxu1 }
  0x89   :  { %1435 = vmatmul.msk.f32.gmra.mxu2 %vm78_vm1, %v1427_v9 }
  0x8a   :  { %v271_v12 = vpop.f32.mrf.mxu3  ;;  %488 = vmatmul.f32.gmra.mxu0 %v1426_v11 }
  0x8e   :  { %v1939_v13 = vpop.f32.mrf.mxu1 }
  0x92   :  { %v1947_v16 = vpop.f32.mrf.mxu3 }
  0x96   :  { %v1952_v18 = vpop.f32.mrf.mxu1 }
  0x9a   :  { %v1954_v19 = vpop.f32.mrf.mxu3 }
  0x9f   :  { %v121_v20 = vpop.f32.mrf.mxu0 }
  0xa0   :  { %v1956_v21 = vpop.f32.mrf.mxu1  ;;  %v160_v59 = vadd.f32 %v1933_v10, %v121_v20 }
  0xa2   :  { %v1958_v22 = vpop.f32.mrf.mxu3 }
  0xa4   :  { %v233_v23 = vpop.f32.mrf.mxu2 }
  0xa5   :  { %v272_v57 = vadd.f32 %v271_v12, %v233_v23 }
  0xa7   :  { %v124_v25 = vpop.f32.mrf.mxu0  ;;  %v292_v61 = vmax.f32 %v160_v59, %v272_v57 }
  0xa8   :  { %v1963_v26 = vpop.f32.mrf.mxu1  ;;  %v163_v9 = vadd.f32 %v1939_v13, %v124_v25  ;;  %v737_v13 = vld [vmem:[%s2361_s3 + $0x78] sm:$0xff]  ;;  %v763_v25 = vld [vmem:[%s2361_s3 + $0x88] sm:$0xff] }
  0xaa   :  { %v1965_v27 = vpop.f32.mrf.mxu3 }
  0xac   :  { %v236_v28 = vpop.f32.mrf.mxu2 }
  0xad   :  { %v275_v6 = vadd.f32 %v1947_v16, %v236_v28  ;;  %v711_v16 = vld [vmem:[%s2361_s3 + $0x68] sm:$0xff] }
  0xaf   :  { %v1970_v30 = vpop.f32.mrf.mxu0  ;;  %v293_v12 = vmax.f32 %v163_v9, %v275_v6 }
  0xb0   :  { %v1980_v34 = vpop.f32.mrf.mxu1 }
  0xb2   :  { %v1982_v35 = vpop.f32.mrf.mxu3 }
  0xb4   :  { %v1978_v33 = vpop.f32.mrf.mxu2 }
  0xb5   :  { %v278_v29 = vadd.f32 %v1954_v19, %v1978_v33  ;;  %v762_v19 = vld [vmem:[%s2361_s3 + $0x80] sm:$0xff]  ;;  %v166_v33 = vadd.f32 %v1952_v18, %v1970_v30  ;;  %v841_v18 = vld [vmem:[%s2361_s3 + $0xb8] sm:$0xff]  ;;  %v867_v30 = vld [vmem:[%s2361_s3 + $0xc8] sm:$0xff] }
  0xb7   :  { %v1984_v36 = vpop.f32.mrf.mxu0  ;;  %v294_v50 = vmax.f32 %v166_v33, %v278_v29  ;;  %v1049_v33 = vld [vmem:[%s2361_s3 + $0x138] sm:$0xff] }
  0xb8   :  { %v1988_v38 = vpop.f32.mrf.mxu1 }
  0xba   :  { %v1992_v40 = vpop.f32.mrf.mxu3 }
  0xbc   :  { %v1986_v37 = vpop.f32.mrf.mxu2 }
  0xbd   :  { %v281_v59 = vadd.f32 %v1958_v22, %v1986_v37  ;;  %v866_v22 = vld [vmem:[%s2361_s3 + $0xc0] sm:$0xff]  ;;  %v169_v37 = vadd.f32 %v1956_v21, %v1984_v36  ;;  %v945_v21 = vld [vmem:[%s2361_s3 + $0xf8] sm:$0xff]  ;;  %v919_v36 = vld [vmem:[%s2361_s3 + $0xe8] sm:$0xff] }
  0xbf   :  { %v1990_v39 = vpop.f32.mrf.mxu0  ;;  %v295_v5 = vmax.f32 %v169_v37, %v281_v59 }
  0xc0   :  { %v352_v44 = vpop.f32.mrf.mxu1 }
  0xc2   :  { %v390_v45 = vpop.f32.mrf.mxu3 }
  0xc3   :  { %v391_v60 = vadd.f32 %v390_v45, %v352_v44  ;;  %v710_v44 = vld [vmem:[%s2361_s3 + $0x60] sm:$0xff] }
  0xc4   :  { %v1997_v42 = vpop.f32.mrf.mxu2 }
  0xc5   :  { %v411_v0 = vmax.f32 %v292_v61, %v391_v60 }
  0xc7   :  { %v1999_v43 = vpop.f32.mrf.mxu0 }
  0xc8   :  { %v355_v54 = vpop.f32.mrf.mxu1 }
  0xca   :  { %v393_v55 = vpop.f32.mrf.mxu3 }
  0xcb   :  { %v394_v10 = vadd.f32 %v393_v55, %v355_v54 }
  0xcc   :  { %v2007_v48 = vpop.f32.mrf.mxu2 }
  0xcd   :  { %v412_v17 = vmax.f32 %v293_v12, %v394_v10 }
  0xcf   :  { %v2021_v53 = vpop.f32.mrf.mxu0 }
  0xd0   :  { %v358_v1 = vpop.f32.mrf.mxu1 }
  0xd2   :  { %v396_v4 = vpop.f32.mrf.mxu3 }
  0xd3   :  { %v397_v47 = vadd.f32 %v396_v4, %v358_v1 }
  0xd4   :  { %v2023_v56 = vpop.f32.mrf.mxu2 }
  0xd5   :  { %v413_v54 = vmax.f32 %v294_v50, %v397_v47  ;;  %v1023_v47 = vld [vmem:[%s2361_s3 + $0x128] sm:$0xff] }
  0xd7   :  { %v471_v58 = vpop.f32.mrf.mxu0 }
  0xd8   :  { %v361_v31 = vpop.f32.mrf.mxu1 }
  0xda   :  { %v399_v45 = vpop.f32.mrf.mxu3 }
  0xdc   :  { %v509_v62 = vpop.f32.mrf.mxu2 }
  0xdd   :  { %v510_v2 = vadd.f32 %v509_v62, %v471_v58  ;;  %v815_v58 = vld [vmem:[%s2361_s3 + $0xa8] sm:$0xff]  ;;  %v814_v62 = vld [vmem:[%s2361_s3 + $0xa0] sm:$0xff] }
  0xdf   :  { %v530_v7 = vmax.f32 %v411_v0, %v510_v2  ;;  %v474_v8 = vpop.f32.mrf.mxu0  ;;  %v400_v0 = vadd.f32 %v399_v45, %v361_v31 }
  0xe0   :  { %v364_v1 = vpop.f32.mrf.mxu1 }
  0xe1   :  { %v541_v11 = vadd.f32 %v2032_v3, %v530_v7 }
  0xe2   :  { %v402_v4 = vpop.f32.mrf.mxu3 }
  0xe3   :  { %v548_v14 = vmax.f32 %v541_v11, 0.0 }
  0xe4   :  { %v512_v15 = vpop.f32.mrf.mxu2 }
  0xe5   :  { %v513_v20 = vadd.f32 %v512_v15, %v474_v8  ;;  %v560_v23 = vrot.slane %v548_v14, 2  ;;  %v608_v24 = vrot.slane %v548_v14, 4  ;;  %v634_v28 = vrot.slane %v548_v14, 6 }
  0xe6   :  { %v414_v8 = vmax.f32 %v295_v5, %v400_v0 }
  0xe7   :  { %v531_v32 = vmax.f32 %v412_v17, %v513_v20  ;;  %1436 = vmatmul.msk.f32.vlgmr.msra.gmra.mxu0 %vm561_vm2, %v560_v23  ;;  %1438 = vmatmul.msk.f32.vlgmr.msra.gmra.mxu1 %vm561_vm2, %v608_v24  ;;  %v477_v41 = vpop.f32.mrf.mxu0  ;;  %v997_v20 = vld [vmem:[%s2361_s3 + $0x118] sm:$0xff]  ;;  %v971_v23 = vld [vmem:[%s2361_s3 + $0x108] sm:$0xff]  ;;  %v172_v24 = vadd.f32 %v1963_v26, %v1990_v39 }
  0xe8   :  { %1439 = vmatmul.msk.f32.vlgmr.msra.gmra.mxu3 %vm561_vm2, %v634_v28  ;;  %729 = vmatpush.msra.mxu1 %v711_v16  ;;  %v403_v16 = vadd.f32 %v402_v4, %v364_v1  ;;  %v367_v31 = vpop.f32.mrf.mxu1  ;;  %v1153_v1 = vld [vmem:[%s2361_s3 + $0x178] sm:$0xff]  ;;  %v290_v4 = vadd.f32 %v1992_v40, %v2023_v56  ;;  %v1126_v40 = vld [vmem:[%s2361_s3 + $0x160] sm:$0xff]  ;;  %v178_v56 = vadd.f32 %v1988_v38, %v2021_v53 }
  0xe9   :  { %v542_v49 = vadd.f32 %v2032_v3, %v531_v32  ;;  %755 = vmatpush.msra.mxu3 %v737_v13  ;;  %781 = vmatpush.msra.mxu0 %v763_v25  ;;  %v970_v13 = vld [vmem:[%s2361_s3 + $0x100] sm:$0xff]  ;;  %v996_v25 = vld [vmem:[%s2361_s3 + $0x110] sm:$0xff] }
  0xea   :  { %730 = vmatpush.msra.mxu1 %v710_v44  ;;  %v405_v26 = vpop.f32.mrf.mxu3 }
  0xeb   :  { %v549_v51 = vmax.f32 %v542_v49, 0.0  ;;  %756 = vmatpush.msra.mxu3 %v736_v46  ;;  %782 = vmatpush.msra.mxu0 %v762_v19  ;;  %v287_v49 = vadd.f32 %v1982_v35, %v2007_v48  ;;  %v1048_v35 = vld [vmem:[%s2361_s3 + $0x130] sm:$0xff]  ;;  %v1022_v48 = vld [vmem:[%s2361_s3 + $0x120] sm:$0xff] }
  0xec   :  { %v515_v52 = vpop.f32.mrf.mxu2 }
  0xed   :  { %v516_v55 = vadd.f32 %v515_v52, %v477_v41  ;;  %v686_v57 = vrot.slane %v549_v51, 2  ;;  %v712_v10 = vrot.slane %v549_v51, 4  ;;  %v738_v12 = vrot.slane %v549_v51, 6  ;;  %v1075_v52 = vld [vmem:[%s2361_s3 + $0x148] sm:$0xff] }
  0xef   :  { %v532_v60 = vmax.f32 %v413_v54, %v516_v55  ;;  %1437 = vmatmul.msk.f32.vlgmr.msrb.gmra.mxu0 %vm561_vm2, %v548_v14  ;;  %1440 = vmatmul.msk.f32.vlgmr.msrb.gmra.mxu1 %vm561_vm2, %v549_v51  ;;  %v480_v61 = vpop.f32.mrf.mxu0  ;;  %v284_v14 = vadd.f32 %v1965_v27, %v1997_v42  ;;  %v944_v27 = vld [vmem:[%s2361_s3 + $0xf0] sm:$0xff]  ;;  %v918_v42 = vld [vmem:[%s2361_s3 + $0xe0] sm:$0xff]  ;;  %v1101_v51 = vld [vmem:[%s2361_s3 + $0x158] sm:$0xff]  ;;  %v175_v55 = vadd.f32 %v1980_v34, %v1999_v43 }
  0xf0   :  { %1441 = vmatmul.msk.f32.vlgmr.msrb.gmra.mxu3 %vm561_vm2, %v686_v57  ;;  %833 = vmatpush.msrb.mxu1 %v815_v58  ;;  %v406_v57 = vadd.f32 %v405_v26, %v367_v31 }
  0xf1   :  { %v543_v2 = vadd.f32 %v2032_v3, %v532_v60  ;;  %859 = vmatpush.msrb.mxu3 %v841_v18  ;;  %885 = vmatpush.msrb.mxu0 %v867_v30  ;;  %v296_v29 = vmax.f32 %v172_v24, %v284_v14  ;;  %v1074_v18 = vld [vmem:[%s2361_s3 + $0x140] sm:$0xff]  ;;  %v1100_v30 = vld [vmem:[%s2361_s3 + $0x150] sm:$0xff]  ;;  %v297_v59 = vmax.f32 %v175_v55, %v287_v49 }
  0xf2   :  { %834 = vmatpush.msrb.mxu1 %v814_v62  ;;  %v408_v37 = vpop.f32.mrf.mxu3 }
  0xf3   :  { %v550_v6 = vmax.f32 %v543_v2, 0.0  ;;  %860 = vmatpush.msrb.mxu3 %v840_v63  ;;  %886 = vmatpush.msrb.mxu0 %v866_v22  ;;  %v415_v41 = vmax.f32 %v296_v29, %v403_v16  ;;  %v416_v43 = vmax.f32 %v297_v59, %v406_v57  ;;  %v370_v22 = vpop.f32.mrf.mxu1  ;;  %v1127_v2 = vld [vmem:[%s2361_s3 + $0x168] sm:$0xff]  ;;  %v1222_v29 = vld [vmem:[%s2363_s5 + $0x60] sm:$0xff] }
  0xf4   :  { %v518_v7 = vpop.f32.mrf.mxu2  ;;  %v1214_v57 = vld [vmem:[%s2363_s5 + $0x20] sm:$0xff] }
  0xf5   :  { %v519_v9 = vadd.f32 %v518_v7, %v480_v61  ;;  %v790_v11 = vrot.slane %v550_v6, 2  ;;  %v816_v45 = vrot.slane %v550_v6, 4  ;;  %v842_v19 = vrot.slane %v550_v6, 6  ;;  %v1152_v7 = vld [vmem:[%s2361_s3 + $0x170] sm:$0xff] }
  0xf7   :  { %v533_v15 = vmax.f32 %v414_v8, %v519_v9  ;;  %1442 = vmatmul.msk.f32.vlgmr.msra.gmra.mxu1 %vm561_vm2, %v712_v10  ;;  %1444 = vmatmul.msk.f32.vlgmr.msra.gmra.mxu0 %vm561_vm2, %v550_v6  ;;  %v483_v17 = vpop.f32.mrf.mxu0  ;;  %v1179_v6 = vld [vmem:[%s2361_s3 + $0x188] sm:$0xff]  ;;  %v409_v8 = vadd.f32 %v408_v37, %v370_v22  ;;  %v1178_v10 = vld [vmem:[%s2361_s3 + $0x180] sm:$0xff] }
  0xf8   :  { %1443 = vmatmul.msk.f32.vlgmr.msra.gmra.mxu3 %vm561_vm2, %v738_v12  ;;  %1445 = vmatmul.msk.f32.vlgmr.msra.gmra.mxu2 %vm561_vm2, %v790_v11  ;;  %v298_v12 = vmax.f32 %v178_v56, %v290_v4  ;;  %v1210_v37 = vld [vmem:[%s2363_s5] sm:$0xff]  ;;  %v1272_v4 = vld [vmem:[%s2366_s8 + $0x78] sm:$0xff] }
  0xf9   :  { %v544_v28 = vadd.f32 %v2032_v3, %v533_v15  ;;  %963 = vmatpush.msra.mxu3 %v945_v21  ;;  %937 = vmatpush.msra.mxu1 %v919_v36 }
  0xfa   :  { %1015 = vmatpush.msra.mxu2 %v997_v20  ;;  %989 = vmatpush.msra.mxu0 %v971_v23  ;;  %v417_v14 = vmax.f32 %v298_v12, %v409_v8  ;;  %v1269_v8 = vld [vmem:[%s2366_s8 + $0x60] sm:$0xff] }
  0xfb   :  { %v551_v32 = vmax.f32 %v544_v28, 0.0  ;;  %964 = vmatpush.msra.mxu3 %v944_v27  ;;  %938 = vmatpush.msra.mxu1 %v918_v42 }
  0xfc   :  { %v521_v39 = vpop.f32.mrf.mxu2  ;;  %990 = vmatpush.msra.mxu0 %v970_v13  ;;  %1016 = vmatpush.msra.mxu2 %v996_v25  ;;  %v1225_v13 = vld [vmem:[%s2363_s5 + $0x78] sm:$0xff]  ;;  %v1223_v25 = vld [vmem:[%s2363_s5 + $0x68] sm:$0xff] }
  0xfd   :  { %v522_v44 = vadd.f32 %v521_v39, %v483_v17  ;;  %v894_v46 = vrot.slane %v551_v32, 2  ;;  %v920_v62 = vrot.slane %v551_v32, 4  ;;  %v946_v0 = vrot.slane %v551_v32, 6  ;;  %v1221_v39 = vld [vmem:[%s2363_s5 + $0x58] sm:$0xff] }
  0xff   :  { %v534_v50 = vmax.f32 %v415_v41, %v522_v44  ;;  %1446 = vmatmul.msk.f32.vlgmr.msrb.gmra.mxu1 %vm561_vm2, %v816_v45  ;;  %1448 = vmatmul.msk.f32.vlgmr.msrb.gmra.mxu0 %vm561_vm2, %v551_v32  ;;  %v486_v54 = vpop.f32.mrf.mxu0  ;;  %v1220_v44 = vld [vmem:[%s2363_s5 + $0x50] sm:$0xff] }
 0x100   :  { %1447 = vmatmul.msk.f32.vlgmr.msrb.gmra.mxu3 %vm561_vm2, %v842_v19  ;;  %1449 = vmatmul.msk.f32.vlgmr.msrb.gmra.mxu2 %vm561_vm2, %v894_v46  ;;  %v1219_v46 = vld [vmem:[%s2363_s5 + $0x48] sm:$0xff] }
 0x101   :  { %v545_v58 = vadd.f32 %v2032_v3, %v534_v50  ;;  %1067 = vmatpush.msrb.mxu3 %v1049_v33  ;;  %1041 = vmatpush.msrb.mxu1 %v1023_v47  ;;  %v1218_v33 = vld [vmem:[%s2363_s5 + $0x40] sm:$0xff] }
 0x102   :  { %1119 = vmatpush.msrb.mxu2 %v1101_v51  ;;  %1093 = vmatpush.msrb.mxu0 %v1075_v52  ;;  %v1217_v51 = vld [vmem:[%s2363_s5 + $0x38] sm:$0xff] }
 0x103   :  { %v552_v60 = vmax.f32 %v545_v58, 0.0  ;;  %1068 = vmatpush.msrb.mxu3 %v1048_v35  ;;  %1042 = vmatpush.msrb.mxu1 %v1022_v48  ;;  %v1216_v35 = vld [vmem:[%s2363_s5 + $0x30] sm:$0xff]  ;;  %v1215_v48 = vld [vmem:[%s2363_s5 + $0x28] sm:$0xff] }
 0x104   :  { %v524_v34 = vpop.f32.mrf.mxu2  ;;  %1094 = vmatpush.msrb.mxu0 %v1074_v18  ;;  %1120 = vmatpush.msrb.mxu2 %v1100_v30 }
 0x105   :  { %v525_v61 = vadd.f32 %v524_v34, %v486_v54  ;;  %v998_v63 = vrot.slane %v552_v60, 2  ;;  %v1024_v38 = vrot.slane %v552_v60, 4  ;;  %v1050_v17 = vrot.slane %v552_v60, 6 }
 0x107   :  { %v535_v5 = vmax.f32 %v416_v43, %v525_v61  ;;  %1450 = vmatmul.msk.f32.vlgmr.msra.gmra.mxu1 %vm561_vm2, %v920_v62  ;;  %1452 = vmatmul.msk.f32.vlgmr.msra.gmra.mxu0 %vm561_vm2, %v552_v60  ;;  %v489_v11 = vpop.f32.mrf.mxu0  ;;  %v1213_v60 = vld [vmem:[%s2363_s5 + $0x18] sm:$0xff]  ;;  %v1212_v43 = vld [vmem:[%s2363_s5 + $0x10] sm:$0xff] }
 0x108   :  { %1451 = vmatmul.msk.f32.vlgmr.msra.gmra.mxu3 %vm561_vm2, %v946_v0  ;;  %1453 = vmatmul.msk.f32.vlgmr.msra.gmra.mxu2 %vm561_vm2, %v998_v63  ;;  %v1211_v63 = vld [vmem:[%s2363_s5 + $0x8] sm:$0xff] }
 0x109   :  { %v546_v9 = vadd.f32 %v2032_v3, %v535_v5  ;;  %1171 = vmatpush.msra.mxu3 %v1153_v1  ;;  %1145 = vmatpush.msra.mxu1 %v1127_v2  ;;  %v1271_v5 = vld [vmem:[%s2366_s8 + $0x70] sm:$0xff] }
 0x10a   :  { %1197 = vmatpush.msra.mxu0 %v1179_v6  ;;  %1230 = vmatpush.msra.mxu2 %v1225_v13 }
 0x10b   :  { %v553_v21 = vmax.f32 %v546_v9, 0.0  ;;  %1172 = vmatpush.msra.mxu3 %v1152_v7  ;;  %1146 = vmatpush.msra.mxu1 %v1126_v40  ;;  %v1270_v40 = vld [vmem:[%s2366_s8 + $0x68] sm:$0xff] }
 0x10c   :  { %v527_v36 = vpop.f32.mrf.mxu2  ;;  %1198 = vmatpush.msra.mxu0 %v1178_v10 }
 0x10d   :  { %v528_v15 = vadd.f32 %v527_v36, %v489_v11  ;;  %v1102_v53 = vrot.slane %v553_v21, 2  ;;  %v1128_v42 = vrot.slane %v553_v21, 4  ;;  %v1154_v24 = vrot.slane %v553_v21, 6  ;;  %v1268_v11 = vld [vmem:[%s2366_s8 + $0x58] sm:$0xff]  ;;  %v1267_v36 = vld [vmem:[%s2366_s8 + $0x50] sm:$0xff] }
 0x10f   :  { %v536_v20 = vmax.f32 %v417_v14, %v528_v15  ;;  %1454 = vmatmul.msk.f32.vlgmr.msrb.gmra.mxu1 %vm561_vm2, %v1024_v38  ;;  %1456 = vmatmul.msk.f32.vlgmr.msrb.gmra.mxu0 %vm561_vm2, %v553_v21  ;;  %v1266_v38 = vld [vmem:[%s2366_s8 + $0x48] sm:$0xff] }
 0x110   :  { %1455 = vmatmul.msk.f32.vlgmr.msrb.gmra.mxu3 %vm561_vm2, %v1050_v17  ;;  %1457 = vmatmul.msk.f32.vlgmr.msrb.gmra.mxu2 %vm561_vm2, %v1102_v53 }
 0x111   :  { %v547_v23 = vadd.f32 %v2032_v3, %v536_v20  ;;  %v1224_v3 = vld [vmem:[%s2363_s5 + $0x70] sm:$0xff]  ;;  %1277 = vmatpush.msrb.mxu1 %v1272_v4  ;;  %v1265_v20 = vld [vmem:[%s2366_s8 + $0x40] sm:$0xff] }
 0x112   :  { %1231 = vmatpush.msra.mxu2 %v1224_v3  ;;  %v1262_v3 = vld [vmem:[%s2366_s8 + $0x28] sm:$0xff]  ;;  %v1304_v4 = vld [vmem:[%s2369_s11] sm:$0xff] }
 0x113   :  { %v554_v27 = vmax.f32 %v547_v23, 0.0  ;;  %1278 = vmatpush.msrb.mxu1 %v1271_v5  ;;  %v1466_v5 = vld [vmem:[%s2367_s9] ss:$0 sm:$0xff]  ;;  %s1353_s9 = sshll.u32 %s2371_s13, 4  ;;  %s1354_s9 = int_to_ptr.hbm [resolvable:$true] %s1353_s9 }
 0x114   :  { %1232 = vmatpush.msra.mxu2 %v1223_v25 }
 0x115   :  { %1279 = vmatpush.msrb.mxu1 %v1270_v40 }
 0x116   :  { %1233 = vmatpush.msra.mxu2 %v1222_v29 }
 0x117   :  { %1458 = vmatmul.msk.f32.vlgmr.msra.gmra.mxu1 %vm561_vm2, %v1128_v42  ;;  %1460 = vmatmul.msk.f32.vlgmr.msra.gmra.mxu0 %vm561_vm2, %v554_v27  ;;  %v1264_v27 = vld [vmem:[%s2366_s8 + $0x38] sm:$0xff] }
 0x118   :  { %1459 = vmatmul.msk.f32.vlgmr.msra.gmra.mxu3 %vm561_vm2, %v1154_v24  ;;  %1234 = vmatpush.msra.mxu2 %v1221_v39  ;;  %v1260_v39 = vld [vmem:[%s2366_s8 + $0x18] sm:$0xff] }
 0x119   :  { %1280 = vmatpush.msrb.mxu1 %v1269_v8 }
 0x11a   :  { %1235 = vmatpush.msra.mxu2 %v1220_v44 }
 0x11b   :  { %1281 = vmatpush.msrb.mxu1 %v1268_v11 }
 0x11c   :  { %1236 = vmatpush.msra.mxu2 %v1219_v46 }
 0x11d   :  { %1282 = vmatpush.msrb.mxu1 %v1267_v36 }
 0x11e   :  { %1237 = vmatpush.msra.mxu2 %v1218_v33 }
 0x11f   :  { %1283 = vmatpush.msrb.mxu1 %v1266_v38 }
 0x120   :  { %1238 = vmatpush.msra.mxu2 %v1217_v51  ;;  %v1257_v51 = vld [vmem:[%s2366_s8] sm:$0xff] }
 0x121   :  { %1284 = vmatpush.msrb.mxu1 %v1265_v20 }
 0x122   :  { %1239 = vmatpush.msra.mxu2 %v1216_v35  ;;  %v1317_v35 = vld [vmem:[%s2369_s11 + $0x68] sm:$0xff] }
 0x123   :  { %1285 = vmatpush.msrb.mxu1 %v1264_v27 }
 0x124   :  { %1240 = vmatpush.msra.mxu2 %v1215_v48  ;;  %v1316_v48 = vld [vmem:[%s2369_s11 + $0x60] sm:$0xff] }
 0x126   :  { %1241 = vmatpush.msra.mxu2 %v1214_v57  ;;  %v1314_v57 = vld [vmem:[%s2369_s11 + $0x50] sm:$0xff] }
 0x128   :  { %1242 = vmatpush.msra.mxu2 %v1213_v60  ;;  %v1309_v60 = vld [vmem:[%s2369_s11 + $0x28] sm:$0xff] }
 0x12a   :  { %1243 = vmatpush.msra.mxu2 %v1212_v43  ;;  %v1307_v43 = vld [vmem:[%s2369_s11 + $0x18] sm:$0xff] }
 0x12c   :  { %1244 = vmatpush.msra.mxu2 %v1211_v63 }
 0x12e   :  { %1245 = vmatpush.msra.mxu2 %v1210_v37 }
 0x164   :  { %v581_v16 = vpop.f32.mrf.mxu0  ;;  %v628_v28 = vpop.f32.mrf.mxu1 }
 0x16b   :  { %v654_v31 = vpop.f32.mrf.mxu3 }
 0x16c   :  { %v603_v32 = vpop.f32.mrf.mxu0  ;;  %v680_v26 = vpop.f32.mrf.mxu1 }
 0x16d   :  { %v604_v41 = vadd.f32 %v603_v32, %v581_v16 }
 0x16f   :  { %v631_v45 = vadd.f32 %v628_v28, %v604_v41  ;;  %v1263_v28 = vld [vmem:[%s2366_s8 + $0x30] sm:$0xff] }
 0x170   :  { %1286 = vmatpush.msrb.mxu1 %v1263_v28 }
 0x171   :  { %v657_v19 = vadd.f32 %v654_v31, %v631_v45  ;;  %v1261_v31 = vld [vmem:[%s2366_s8 + $0x20] sm:$0xff] }
 0x172   :  { %1287 = vmatpush.msrb.mxu1 %v1262_v3  ;;  %v1463_v45 = vld [vmem:[%s2362_s4] ss:$0 sm:$0xff] }
 0x173   :  { %v683_v47 = vadd.f32 %v680_v26, %v657_v19  ;;  %v706_v49 = vpop.f32.mrf.mxu3 }
 0x174   :  { %v732_v50 = vpop.f32.mrf.mxu1  ;;  %v784_v52 = vpop.f32.mrf.mxu0  ;;  %1288 = vmatpush.msrb.mxu1 %v1261_v31 }
 0x175   :  { %v709_v54 = vadd.f32 %v706_v49, %v683_v47  ;;  %v1259_v49 = vld [vmem:[%s2366_s8 + $0x10] sm:$0xff] }
 0x176   :  { %1289 = vmatpush.msrb.mxu1 %v1260_v39 }
 0x177   :  { %v735_v55 = vadd.f32 %v732_v50, %v709_v54  ;;  %v1258_v50 = vld [vmem:[%s2366_s8 + $0x8] sm:$0xff]  ;;  %v1318_v54 = vld [vmem:[%s2369_s11 + $0x70] sm:$0xff] }
 0x178   :  { %1290 = vmatpush.msrb.mxu1 %v1259_v49 }
 0x17a   :  { %1291 = vmatpush.msrb.mxu1 %v1258_v50 }
 0x17b   :  { %v758_v58 = vpop.f32.mrf.mxu3  ;;  %v810_v18 = vpop.f32.mrf.mxu2 }
 0x17c   :  { %v761_v30 = vadd.f32 %v758_v58, %v735_v55  ;;  %v836_v59 = vpop.f32.mrf.mxu1  ;;  %v888_v61 = vpop.f32.mrf.mxu0  ;;  %1292 = vmatpush.msrb.mxu1 %v1257_v51  ;;  %v1315_v55 = vld [vmem:[%s2369_s11 + $0x58] sm:$0xff]  ;;  %v1313_v58 = vld [vmem:[%s2369_s11 + $0x48] sm:$0xff] }
 0x17e   :  { %v787_v34 = vadd.f32 %v784_v52, %v761_v30  ;;  %v1319_v52 = vld [vmem:[%s2369_s11 + $0x78] sm:$0xff] }
 0x17f   :  { %1324 = vmatpush.msrb.mxu3 %v1319_v52  ;;  %v1311_v30 = vld [vmem:[%s2369_s11 + $0x38] sm:$0xff] }
 0x180   :  { %v813_v62 = vadd.f32 %v810_v18, %v787_v34  ;;  %v1312_v18 = vld [vmem:[%s2369_s11 + $0x40] sm:$0xff] }
 0x181   :  { %1325 = vmatpush.msrb.mxu3 %v1318_v54  ;;  %v1308_v34 = vld [vmem:[%s2369_s11 + $0x20] sm:$0xff] }
 0x182   :  { %v839_v22 = vadd.f32 %v836_v59, %v813_v62  ;;  %v1310_v59 = vld [vmem:[%s2369_s11 + $0x30] sm:$0xff]  ;;  %v1465_v62 = vld [vmem:[%s2365_s7] ss:$0 sm:$0xff] }
 0x183   :  { %v862_v0 = vpop.f32.mrf.mxu3  ;;  %v914_v1 = vpop.f32.mrf.mxu2  ;;  %1326 = vmatpush.msrb.mxu3 %v1317_v35 }
 0x184   :  { %v865_v2 = vadd.f32 %v862_v0, %v839_v22  ;;  %v940_v6 = vpop.f32.mrf.mxu1  ;;  %v992_v9 = vpop.f32.mrf.mxu0 }
 0x185   :  { %1327 = vmatpush.msrb.mxu3 %v1316_v48 }
 0x186   :  { %v891_v7 = vadd.f32 %v888_v61, %v865_v2  ;;  %v1464_v61 = vld [vmem:[%s2364_s6] ss:$0 sm:$0xff]  ;;  %v1305_v2 = vld [vmem:[%s2369_s11 + $0x8] sm:$0xff] }
 0x187   :  { %1328 = vmatpush.msrb.mxu3 %v1315_v55 }
 0x188   :  { %v917_v56 = vadd.f32 %v914_v1, %v891_v7  ;;  %v1306_v1 = vld [vmem:[%s2369_s11 + $0x10] sm:$0xff]  ;;  %s1495_s11 = smov [#allocation2]  }
 0x189   :  { %1329 = vmatpush.msrb.mxu3 %v1314_v57  ;;  %s1351_s30 = sshll.u32 %s1495_s11, 4  ;;  %s1352_s30 = int_to_ptr.vmem [resolvable:$true] %s1351_s30 }
 0x18a   :  { %v943_v10 = vadd.f32 %v940_v6, %v917_v56  ;;  %v1467_v6 = vld [vmem:[%s2368_s10] ss:$0 sm:$0xff] }
 0x18b   :  { %v966_v12 = vpop.f32.mrf.mxu3  ;;  %v1018_v14 = vpop.f32.mrf.mxu2  ;;  %1330 = vmatpush.msrb.mxu3 %v1313_v58 }
 0x18c   :  { %v969_v21 = vadd.f32 %v966_v12, %v943_v10  ;;  %v1044_v53 = vpop.f32.mrf.mxu1  ;;  %v1096_v42 = vpop.f32.mrf.mxu0 }
 0x18d   :  { %1331 = vmatpush.msrb.mxu3 %v1312_v18 }
 0x18e   :  { %v995_v15 = vadd.f32 %v992_v9, %v969_v21  ;;  %v1468_v9 = vld [vmem:[%s2370_s12] ss:$0 sm:$0xff] }
 0x18f   :  { %1332 = vmatpush.msrb.mxu3 %v1311_v30 }
 0x190   :  { %v1021_v17 = vadd.f32 %v1018_v14, %v995_v15 }
 0x191   :  { %1333 = vmatpush.msrb.mxu3 %v1310_v59 }
 0x192   :  { %v1047_v23 = vadd.f32 %v1044_v53, %v1021_v17 }
 0x193   :  { %v1070_v24 = vpop.f32.mrf.mxu3  ;;  %v1122_v25 = vpop.f32.mrf.mxu2  ;;  %1334 = vmatpush.msrb.mxu3 %v1309_v60 }
 0x194   :  { %v1073_v16 = vadd.f32 %v1070_v24, %v1047_v23  ;;  %v1148_v32 = vpop.f32.mrf.mxu1  ;;  %v1200_v46 = vpop.f32.mrf.mxu0 }
 0x195   :  { %1335 = vmatpush.msrb.mxu3 %v1308_v34 }
 0x196   :  { %v1099_v13 = vadd.f32 %v1096_v42, %v1073_v16 }
 0x197   :  { %1336 = vmatpush.msrb.mxu3 %v1307_v43 }
 0x198   :  { %v1125_v29 = vadd.f32 %v1122_v25, %v1099_v13 }
 0x199   :  { %1337 = vmatpush.msrb.mxu3 %v1306_v1 }
 0x19a   :  { %v1151_v26 = vadd.f32 %v1148_v32, %v1125_v29 }
 0x19b   :  { %v1174_v41 = vpop.f32.mrf.mxu3  ;;  %1338 = vmatpush.msrb.mxu3 %v1305_v2 }
 0x19c   :  { %v1177_v44 = vadd.f32 %v1174_v41, %v1151_v26 }
 0x19d   :  { %1339 = vmatpush.msrb.mxu3 %v1304_v4 }
 0x19e   :  { %v1203_v19 = vadd.f32 %v1200_v46, %v1177_v44 }
 0x1a0   :  { %v1208_v33 = vadd.f32 %v1463_v45, %v1203_v19 }
 0x1a2   :  { %v1209_v47 = vmax.f32 %v1208_v33, 0.0 }
 0x1a4   :  { %1246 = vmatmul.f32.vlgmr.msra.gmra.mxu2 %v1209_v47 }
 0x227   :  { %v1247_v63 = vpop.f32.mrf.mxu2 }
 0x228   :  { %v1248_v22 = vadd.f32 %v1464_v61, %v1247_v63 }
 0x22a   :  { %vm1250_vm3 = vcmp.ge.f32.partialorder %v1248_v22, 0.0  ;;  %v1255_v37 = vmul.f32 %v1465_v62, %v1248_v22 }
 0x22c   :  { %v1256_v0 = vsel %vm1250_vm3, %v1248_v22, %v1255_v37 }
 0x22d   :  { %1293 = vmatmul.f32.vlgmr.msrb.gmra.mxu1 %v1256_v0 }
 0x2aa   :  { %v1294_v7 = vpop.f32.mrf.mxu1 }
 0x2ab   :  { %v1295_v40 = vadd.f32 %v1466_v5, %v1294_v7 }
 0x2ad   :  { %vm1297_vm4 = vcmp.ge.f32.partialorder %v1295_v40, 0.0  ;;  %v1302_v56 = vmul.f32 %v1467_v6, %v1295_v40 }
 0x2af   :  { %v1303_v8 = vsel %vm1297_vm4, %v1295_v40, %v1302_v56 }
 0x2b0   :  { %1340 = vmatmul.f32.vlgmr.msrb.gmra.mxu3 %v1303_v8 }
 0x333   :  { %v1341_v10 = vpop.f32.mrf.mxu3 }
 0x334   :  { %v1342_v11 = vadd.f32 %v1468_v9, %v1341_v10 }
 0x336   :  { %1345 = vst.msk [vmem:[#allocation2] sm:$0x3] %vm1344_vm5, %v1342_v11 }
 0x337   :  { %1356 = dma.vmem_to_hbm [thread:$0]  %s1352_s30, 32, %s1354_s9, [#allocation3]  }
 0x338   :  { %1493 = dma.done.wait [#allocation3], 32  }
 0x339   :  { %1494 = vsyncadd [#allocation3], 4294967264 }
 0x33a   :  { %1361 = vsyncpa [#allocation3], 1 }

</bundles_post_ra>
